<compile_context>
chip_gen: v7x
topology: tpu7x:2x2x1
jax: 0.10.0
libtpu: 0.0.40
codegen_flags: <defaults>
</compile_context>

<pallas_src>
import numpy as np
import jax
import jax.numpy as jnp
from jax.experimental import pallas as pl
from jax.experimental.pallas import tpu as pltpu


def darnn_kernel(
    xflat_ref, yh_ref,
    ewih_ref, ewhh_ref, eb_ref,
    wtc_ref, wty_ref, btil_ref,
    dwih_ref, dwhh_ref, db_ref,
    wy_d_ref, wy_c_ref, bwy_ref, vy_ref, bvy_ref,
    out_ref,
):
    f32 = jnp.float32
    B, T = yh_ref.shape
    N = ewih_ref.shape[0]
    M = ewhh_ref.shape[0]
    P = dwhh_ref.shape[0]

    # ----------------------------- encoder -----------------------------
    # alpha_k_t == 1/N exactly (softmax of a row-constant score), so the
    # weighted input is X[:, t, :] / N.  The input-side gate contribution for
    # all T steps is one matmul, hoisted off the recurrence.
    xs = xflat_ref[...] * (1.0 / N)                                     # (T*B, N)
    gin_enc = (jnp.dot(xs, ewih_ref[...], preferred_element_type=f32)
               + eb_ref[...])                                           # (T*B, 4M)

    h = jnp.zeros((B, M), f32)
    s = jnp.zeros((B, M), f32)
    esum = jnp.zeros((B, M), f32)
    for t in range(T):
        # PyTorch LSTMCell, gate order (i, f, g, o); state s is the cell state.
        gates = (gin_enc[t * B:(t + 1) * B, :]
                 + jnp.dot(h, ewhh_ref[...], preferred_element_type=f32))   # (B, 4M)
        i_g = jax.nn.sigmoid(gates[:, 0 * M:1 * M])
        f_g = jax.nn.sigmoid(gates[:, 1 * M:2 * M])
        g_g = jnp.tanh(gates[:, 2 * M:3 * M])
        o_g = jax.nn.sigmoid(gates[:, 3 * M:4 * M])
        s = f_g * s + i_g * g_g
        h = o_g * jnp.tanh(s)
        esum = esum + h

    # ----------------------------- decoder -----------------------------
    # beta_i_t == 1/T exactly, so c_t is the mean of the encoder states and is
    # constant across decoder steps.
    c_t = esum * (1.0 / T)                                              # (B, M)

    # w_tilda([c_t, y_t]) for all T steps at once:
    #   y_tilda[:, t] = <c_t, w_c> + b + y[:, t] * w_y
    y_til_all = (jnp.sum(c_t * wtc_ref[...], axis=1, keepdims=True)
                 + btil_ref[...]
                 + yh_ref[...] * wty_ref[...])                          # (B, T)

    d = jnp.zeros((B, P), f32)
    sp = jnp.zeros((B, P), f32)
    for t in range(T):
        gates = (y_til_all[:, t:t + 1] * dwih_ref[...]                  # (B,1)*(1,4P)
                 + jnp.dot(d, dwhh_ref[...], preferred_element_type=f32)
                 + db_ref[...])                                         # (B, 4P)
        i_g = jax.nn.sigmoid(gates[:, 0 * P:1 * P])
        f_g = jax.nn.sigmoid(gates[:, 1 * P:2 * P])
        g_g = jnp.tanh(gates[:, 2 * P:3 * P])
        o_g = jax.nn.sigmoid(gates[:, 3 * P:4 * P])
        sp = f_g * sp + i_g * g_g
        d = o_g * jnp.tanh(sp)

    # ----------------------------- output head -----------------------------
    hidden = (jnp.dot(d, wy_d_ref[...], preferred_element_type=f32)
              + jnp.dot(c_t, wy_c_ref[...], preferred_element_type=f32)
              + bwy_ref[...])                                           # (B, P)
    out_ref[...] = (jnp.sum(hidden * vy_ref[...], axis=1, keepdims=True)
                    + bvy_ref[...])                                     # (B, 1)


def darnn_forward(X_history, y_history, params):
    """X_history: (B, T, N), y_history: (B, T, 1) -> (B, 1)."""
    B, T, N = X_history.shape
    p = params
    M = p["enc_whh"].shape[1]
    P = p["dec_whh"].shape[1]

    # time-major flatten (pure layout prep): row (t*B + b) = X[b, t, :]
    xflat = jnp.transpose(X_history, (1, 0, 2)).reshape(T * B, N).astype(jnp.float32)
    yh_k = y_history[..., 0].astype(jnp.float32)                        # (B, T)

    args = (
        xflat, yh_k,
        # encoder LSTMCell
        p["enc_wih"].T, p["enc_whh"].T, (p["enc_bih"] + p["enc_bhh"]).reshape(1, 4 * M),
        # w_tilda
        p["wtil_w"][:, :M], p["wtil_w"][:, M:].reshape(1, 1), p["wtil_b"].reshape(1, 1),
        # decoder LSTMCell
        p["dec_wih"].T, p["dec_whh"].T, (p["dec_bih"] + p["dec_bhh"]).reshape(1, 4 * P),
        # output head
        p["Wy_w"][:, :P].T, p["Wy_w"][:, P:].T, p["Wy_b"].reshape(1, P),
        p["vy_w"], p["vy_b"].reshape(1, 1),
    )

    # Everything fits comfortably in VMEM; single grid point (latency-bound
    # serial RNN).  Batch scaling would be done by adding a grid over B with
    # dimension_semantics=("parallel",).
    return pl.pallas_call(
        darnn_kernel,
        out_shape=jax.ShapeDtypeStruct((B, 1), jnp.float32),
        in_specs=[pl.BlockSpec(memory_space=pltpu.MemorySpace.VMEM) for _ in args],
        out_specs=pl.BlockSpec(memory_space=pltpu.MemorySpace.VMEM),
    )(*args)


# ------------------------- deterministic parameter init -------------------------
def init_params(key, N, M, P, T):
    ks = jax.random.split(key, 20)

    def u(k, shape, fan_in):
        bound = 1.0 / np.sqrt(fan_in)
        return jax.random.uniform(k, shape, jnp.float32, -bound, bound)

    return {
        "We_w": u(ks[0], (T, 2 * M), 2 * M), "We_b": u(ks[1], (T,), 2 * M),
        "Ue_w": u(ks[2], (T, T), T),
        "enc_wih": u(ks[3], (4 * M, N), M), "enc_whh": u(ks[4], (4 * M, M), M),
        "enc_bih": u(ks[5], (4 * M,), M), "enc_bhh": u(ks[6], (4 * M,), M),
        "Wd_w": u(ks[7], (M, 2 * P), 2 * P), "Wd_b": u(ks[8], (M,), 2 * P),
        "Ud_w": u(ks[9], (M, M), M),
        "wtil_w": u(ks[10], (1, M + 1), M + 1), "wtil_b": u(ks[11], (1,), M + 1),
        "dec_wih": u(ks[12], (4 * P, 1), P), "dec_whh": u(ks[13], (4 * P, P), P),
        "dec_bih": u(ks[14], (4 * P,), P), "dec_bhh": u(ks[15], (4 * P,), P),
        "Wy_w": u(ks[16], (P, P + M), P + M), "Wy_b": u(ks[17], (P,), P + M),
        "vy_w": u(ks[18], (1, P), P), "vy_b": u(ks[19], (1,), P),
    }


# ----------------- pure-JAX reference (mirrors PyTorch literally) -----------------
def _lstm_cell(x, h, c, w_ih, w_hh, b_ih, b_hh):
    gates = x @ w_ih.T + b_ih + h @ w_hh.T + b_hh
    H = h.shape[1]
    i = jax.nn.sigmoid(gates[:, :H])
    f = jax.nn.sigmoid(gates[:, H:2 * H])
    g = jnp.tanh(gates[:, 2 * H:3 * H])
    o = jax.nn.sigmoid(gates[:, 3 * H:4 * H])
    c_new = f * c + i * g
    return o * jnp.tanh(c_new), c_new


def darnn_reference(X, yh, p):
    B, T, N = X.shape
    M = p["enc_whh"].shape[1]
    P = p["dec_whh"].shape[1]
    # encoder (with the full attention-score branch, as in PyTorch)
    h = jnp.zeros((B, M)); s = jnp.zeros((B, M))
    Xp = jnp.transpose(X, (0, 2, 1))                         # (B, N, T)
    enc = []
    for t in range(T):
        hc = jnp.concatenate([h, s], axis=1)
        x = hc @ p["We_w"].T + p["We_b"]                     # (B, T)
        x_rep = jnp.broadcast_to(x[:, None, :], (B, N, T))
        y = jnp.einsum("bnt,qt->bnq", Xp, p["Ue_w"])         # (B, N, T)
        e = jnp.einsum("bnt,bmt->bnm", x_rep, y).sum(-1)     # (B, N)
        alpha = jax.nn.softmax(e, axis=1)
        wx = alpha * X[:, t, :]
        h, s = _lstm_cell(wx, h, s, p["enc_wih"], p["enc_whh"], p["enc_bih"], p["enc_bhh"])
        enc.append(h)
    E = jnp.stack(enc, axis=1)                               # (B, T, M)
    # decoder
    d = jnp.zeros((B, P)); sp = jnp.zeros((B, P))
    for t in range(T):
        ds = jnp.concatenate([d, sp], axis=1)
        x1 = ds @ p["Wd_w"].T + p["Wd_b"]                    # (B, M)
        x1r = jnp.broadcast_to(x1[:, None, :], (B, T, M))
        y1 = jnp.einsum("btm,qm->btq", E, p["Ud_w"])         # (B, T, M)
        l = jnp.einsum("btm,bsm->bts", x1r, y1).sum(-1)      # (B, T)
        beta = jax.nn.softmax(l, axis=1)[:, :, None]
        c_t = jnp.sum(beta * E, axis=1)                      # (B, M)
        yc = jnp.concatenate([c_t, yh[:, t, :]], axis=1)
        y_til = yc @ p["wtil_w"].T + p["wtil_b"]
        d, sp = _lstm_cell(y_til, d, sp, p["dec_wih"], p["dec_whh"], p["dec_bih"], p["dec_bhh"])
    dc = jnp.concatenate([d, c_t], axis=1)
    return (dc @ p["Wy_w"].T + p["Wy_b"]) @ p["vy_w"].T + p["vy_b"]


if __name__ == "__main__":
    # B a multiple of 8 fills the vreg sublanes; still a small shape.
    B, N, M, P, T = 8, 8, 16, 16, 8
    key = jax.random.PRNGKey(0)
    kx, ky, kp = jax.random.split(key, 3)
    X_history = jax.random.normal(kx, (B, T, N), jnp.float32)
    y_history = jax.random.normal(ky, (B, T, 1), jnp.float32)
    params = init_params(kp, N, M, P, T)

    out = darnn_forward(X_history, y_history, params)
    out = jax.block_until_ready(out)
    assert out.shape == (B, 1)

    ref = darnn_reference(X_history, y_history, params)
    if not np.allclose(np.asarray(out), np.asarray(ref), atol=1e-4, rtol=1e-4):
        raise AssertionError(f"mismatch:\nkernel={np.asarray(out)}\nref={np.asarray(ref)}")
    print("KERNEL_OK")
</pallas_src>

<mosaic_0001>
module attributes {stable_mosaic.version = 11 : i64} {
  func.func @darnn_kernel(%arg0: memref<64x8xf32, #tpu.memory_space<vmem>>, %arg1: memref<8x8xf32, #tpu.memory_space<vmem>>, %arg2: memref<8x64xf32, #tpu.memory_space<vmem>>, %arg3: memref<16x64xf32, #tpu.memory_space<vmem>>, %arg4: memref<1x64xf32, #tpu.memory_space<vmem>>, %arg5: memref<1x16xf32, #tpu.memory_space<vmem>>, %arg6: memref<1x1xf32, #tpu.memory_space<vmem>>, %arg7: memref<1x1xf32, #tpu.memory_space<vmem>>, %arg8: memref<1x64xf32, #tpu.memory_space<vmem>>, %arg9: memref<16x64xf32, #tpu.memory_space<vmem>>, %arg10: memref<1x64xf32, #tpu.memory_space<vmem>>, %arg11: memref<16x16xf32, #tpu.memory_space<vmem>>, %arg12: memref<16x16xf32, #tpu.memory_space<vmem>>, %arg13: memref<1x16xf32, #tpu.memory_space<vmem>>, %arg14: memref<1x16xf32, #tpu.memory_space<vmem>>, %arg15: memref<1x1xf32, #tpu.memory_space<vmem>>, %arg16: memref<8x1xf32, #tpu.memory_space<vmem>>) attributes {dimension_semantics = [], scalar_prefetch = 0 : i64, scratch_operands = 0 : i64, tpu.core_type = #tpu.core_type<tc>} {
    %c0 = arith.constant 0 : index
    %c0_0 = arith.constant 0 : index
    %0 = vector.load %arg0[%c0, %c0_0] : memref<64x8xf32, #tpu.memory_space<vmem>>, vector<64x8xf32>
    %cst = arith.constant 1.250000e-01 : f32
    %1 = vector.broadcast %cst : f32 to vector<64x8xf32>
    %2 = arith.mulf %0, %1 : vector<64x8xf32>
    %c0_1 = arith.constant 0 : index
    %c0_2 = arith.constant 0 : index
    %3 = vector.load %arg2[%c0_1, %c0_2] : memref<8x64xf32, #tpu.memory_space<vmem>>, vector<8x64xf32>
    %cst_3 = arith.constant dense<0.000000e+00> : vector<64x64xf32>
    %4 = tpu.matmul %2, %3, %cst_3 {dimension_numbers = #tpu.dot_dimension_numbers<[1], [0], [0], [1], [0, 0, 1, 1], [], []>} : vector<64x8xf32>, vector<8x64xf32>, vector<64x64xf32> -> vector<64x64xf32>
    %c0_4 = arith.constant 0 : index
    %c0_5 = arith.constant 0 : index
    %5 = vector.load %arg4[%c0_4, %c0_5] : memref<1x64xf32, #tpu.memory_space<vmem>>, vector<1x64xf32>
    %6 = vector.broadcast %5 : vector<1x64xf32> to vector<64x64xf32>
    %7 = arith.addf %4, %6 : vector<64x64xf32>
    %cst_6 = arith.constant 0.000000e+00 : f32
    %8 = vector.broadcast %cst_6 : f32 to vector<8x16xf32>
    %cst_7 = arith.constant 0.000000e+00 : f32
    %9 = vector.broadcast %cst_7 : f32 to vector<8x16xf32>
    %cst_8 = arith.constant 0.000000e+00 : f32
    %10 = vector.broadcast %cst_8 : f32 to vector<8x16xf32>
    %11 = vector.extract_strided_slice %7 {offsets = [0, 0], sizes = [8, 64], strides = [1, 1]} : vector<64x64xf32> to vector<8x64xf32>
    %c0_9 = arith.constant 0 : index
    %c0_10 = arith.constant 0 : index
    %12 = vector.load %arg3[%c0_9, %c0_10] : memref<16x64xf32, #tpu.memory_space<vmem>>, vector<16x64xf32>
    %cst_11 = arith.constant dense<0.000000e+00> : vector<8x64xf32>
    %13 = tpu.matmul %8, %12, %cst_11 {dimension_numbers = #tpu.dot_dimension_numbers<[1], [0], [0], [1], [0, 0, 1, 1], [], []>} : vector<8x16xf32>, vector<16x64xf32>, vector<8x64xf32> -> vector<8x64xf32>
    %14 = arith.addf %11, %13 : vector<8x64xf32>
    %15 = vector.extract_strided_slice %14 {offsets = [0, 0], sizes = [8, 16], strides = [1, 1]} : vector<8x64xf32> to vector<8x16xf32>
    %16 = arith.negf %15 : vector<8x16xf32>
    %17 = math.exp %16 : vector<8x16xf32>
    %cst_12 = arith.constant 1.000000e+00 : f32
    %18 = vector.broadcast %cst_12 : f32 to vector<8x16xf32>
    %19 = arith.addf %18, %17 : vector<8x16xf32>
    %20 = arith.divf %18, %19 : vector<8x16xf32>
    %21 = vector.extract_strided_slice %14 {offsets = [0, 16], sizes = [8, 16], strides = [1, 1]} : vector<8x64xf32> to vector<8x16xf32>
    %22 = arith.negf %21 : vector<8x16xf32>
    %23 = math.exp %22 : vector<8x16xf32>
    %cst_13 = arith.constant 1.000000e+00 : f32
    %24 = vector.broadcast %cst_13 : f32 to vector<8x16xf32>
    %25 = arith.addf %24, %23 : vector<8x16xf32>
    %26 = arith.divf %24, %25 : vector<8x16xf32>
    %27 = vector.extract_strided_slice %14 {offsets = [0, 32], sizes = [8, 16], strides = [1, 1]} : vector<8x64xf32> to vector<8x16xf32>
    %28 = math.tanh %27 : vector<8x16xf32>
    %29 = vector.extract_strided_slice %14 {offsets = [0, 48], sizes = [8, 16], strides = [1, 1]} : vector<8x64xf32> to vector<8x16xf32>
    %30 = arith.negf %29 : vector<8x16xf32>
    %31 = math.exp %30 : vector<8x16xf32>
    %cst_14 = arith.constant 1.000000e+00 : f32
    %32 = vector.broadcast %cst_14 : f32 to vector<8x16xf32>
    %33 = arith.addf %32, %31 : vector<8x16xf32>
    %34 = arith.divf %32, %33 : vector<8x16xf32>
    %35 = arith.mulf %26, %9 : vector<8x16xf32>
    %36 = arith.mulf %20, %28 : vector<8x16xf32>
    %37 = arith.addf %35, %36 : vector<8x16xf32>
    %38 = math.tanh %37 : vector<8x16xf32>
    %39 = arith.mulf %34, %38 : vector<8x16xf32>
    %40 = arith.addf %10, %39 : vector<8x16xf32>
    %41 = vector.extract_strided_slice %7 {offsets = [8, 0], sizes = [8, 64], strides = [1, 1]} : vector<64x64xf32> to vector<8x64xf32>
    %c0_15 = arith.constant 0 : index
    %c0_16 = arith.constant 0 : index
    %42 = vector.load %arg3[%c0_15, %c0_16] : memref<16x64xf32, #tpu.memory_space<vmem>>, vector<16x64xf32>
    %cst_17 = arith.constant dense<0.000000e+00> : vector<8x64xf32>
    %43 = tpu.matmul %39, %42, %cst_17 {dimension_numbers = #tpu.dot_dimension_numbers<[1], [0], [0], [1], [0, 0, 1, 1], [], []>} : vector<8x16xf32>, vector<16x64xf32>, vector<8x64xf32> -> vector<8x64xf32>
    %44 = arith.addf %41, %43 : vector<8x64xf32>
    %45 = vector.extract_strided_slice %44 {offsets = [0, 0], sizes = [8, 16], strides = [1, 1]} : vector<8x64xf32> to vector<8x16xf32>
    %46 = arith.negf %45 : vector<8x16xf32>
    %47 = math.exp %46 : vector<8x16xf32>
    %cst_18 = arith.constant 1.000000e+00 : f32
    %48 = vector.broadcast %cst_18 : f32 to vector<8x16xf32>
    %49 = arith.addf %48, %47 : vector<8x16xf32>
    %50 = arith.divf %48, %49 : vector<8x16xf32>
    %51 = vector.extract_strided_slice %44 {offsets = [0, 16], sizes = [8, 16], strides = [1, 1]} : vector<8x64xf32> to vector<8x16xf32>
    %52 = arith.negf %51 : vector<8x16xf32>
    %53 = math.exp %52 : vector<8x16xf32>
    %cst_19 = arith.constant 1.000000e+00 : f32
    %54 = vector.broadcast %cst_19 : f32 to vector<8x16xf32>
    %55 = arith.addf %54, %53 : vector<8x16xf32>
    %56 = arith.divf %54, %55 : vector<8x16xf32>
    %57 = vector.extract_strided_slice %44 {offsets = [0, 32], sizes = [8, 16], strides = [1, 1]} : vector<8x64xf32> to vector<8x16xf32>
    %58 = math.tanh %57 : vector<8x16xf32>
    %59 = vector.extract_strided_slice %44 {offsets = [0, 48], sizes = [8, 16], strides = [1, 1]} : vector<8x64xf32> to vector<8x16xf32>
    %60 = arith.negf %59 : vector<8x16xf32>
    %61 = math.exp %60 : vector<8x16xf32>
    %cst_20 = arith.constant 1.000000e+00 : f32
    %62 = vector.broadcast %cst_20 : f32 to vector<8x16xf32>
    %63 = arith.addf %62, %61 : vector<8x16xf32>
    %64 = arith.divf %62, %63 : vector<8x16xf32>
    %65 = arith.mulf %56, %37 : vector<8x16xf32>
    %66 = arith.mulf %50, %58 : vector<8x16xf32>
    %67 = arith.addf %65, %66 : vector<8x16xf32>
    %68 = math.tanh %67 : vector<8x16xf32>
    %69 = arith.mulf %64, %68 : vector<8x16xf32>
    %70 = arith.addf %40, %69 : vector<8x16xf32>
    %71 = vector.extract_strided_slice %7 {offsets = [16, 0], sizes = [8, 64], strides = [1, 1]} : vector<64x64xf32> to vector<8x64xf32>
    %c0_21 = arith.constant 0 : index
    %c0_22 = arith.constant 0 : index
    %72 = vector.load %arg3[%c0_21, %c0_22] : memref<16x64xf32, #tpu.memory_space<vmem>>, vector<16x64xf32>
    %cst_23 = arith.constant dense<0.000000e+00> : vector<8x64xf32>
    %73 = tpu.matmul %69, %72, %cst_23 {dimension_numbers = #tpu.dot_dimension_numbers<[1], [0], [0], [1], [0, 0, 1, 1], [], []>} : vector<8x16xf32>, vector<16x64xf32>, vector<8x64xf32> -> vector<8x64xf32>
    %74 = arith.addf %71, %73 : vector<8x64xf32>
    %75 = vector.extract_strided_slice %74 {offsets = [0, 0], sizes = [8, 16], strides = [1, 1]} : vector<8x64xf32> to vector<8x16xf32>
    %76 = arith.negf %75 : vector<8x16xf32>
    %77 = math.exp %76 : vector<8x16xf32>
    %cst_24 = arith.constant 1.000000e+00 : f32
    %78 = vector.broadcast %cst_24 : f32 to vector<8x16xf32>
    %79 = arith.addf %78, %77 : vector<8x16xf32>
    %80 = arith.divf %78, %79 : vector<8x16xf32>
    %81 = vector.extract_strided_slice %74 {offsets = [0, 16], sizes = [8, 16], strides = [1, 1]} : vector<8x64xf32> to vector<8x16xf32>
    %82 = arith.negf %81 : vector<8x16xf32>
    %83 = math.exp %82 : vector<8x16xf32>
    %cst_25 = arith.constant 1.000000e+00 : f32
    %84 = vector.broadcast %cst_25 : f32 to vector<8x16xf32>
    %85 = arith.addf %84, %83 : vector<8x16xf32>
    %86 = arith.divf %84, %85 : vector<8x16xf32>
    %87 = vector.extract_strided_slice %74 {offsets = [0, 32], sizes = [8, 16], strides = [1, 1]} : vector<8x64xf32> to vector<8x16xf32>
    %88 = math.tanh %87 : vector<8x16xf32>
    %89 = vector.extract_strided_slice %74 {offsets = [0, 48], sizes = [8, 16], strides = [1, 1]} : vector<8x64xf32> to vector<8x16xf32>
    %90 = arith.negf %89 : vector<8x16xf32>
    %91 = math.exp %90 : vector<8x16xf32>
    %cst_26 = arith.constant 1.000000e+00 : f32
    %92 = vector.broadcast %cst_26 : f32 to vector<8x16xf32>
    %93 = arith.addf %92, %91 : vector<8x16xf32>
    %94 = arith.divf %92, %93 : vector<8x16xf32>
    %95 = arith.mulf %86, %67 : vector<8x16xf32>
    %96 = arith.mulf %80, %88 : vector<8x16xf32>
    %97 = arith.addf %95, %96 : vector<8x16xf32>
    %98 = math.tanh %97 : vector<8x16xf32>
    %99 = arith.mulf %94, %98 : vector<8x16xf32>
    %100 = arith.addf %70, %99 : vector<8x16xf32>
    %101 = vector.extract_strided_slice %7 {offsets = [24, 0], sizes = [8, 64], strides = [1, 1]} : vector<64x64xf32> to vector<8x64xf32>
    %c0_27 = arith.constant 0 : index
    %c0_28 = arith.constant 0 : index
    %102 = vector.load %arg3[%c0_27, %c0_28] : memref<16x64xf32, #tpu.memory_space<vmem>>, vector<16x64xf32>
    %cst_29 = arith.constant dense<0.000000e+00> : vector<8x64xf32>
    %103 = tpu.matmul %99, %102, %cst_29 {dimension_numbers = #tpu.dot_dimension_numbers<[1], [0], [0], [1], [0, 0, 1, 1], [], []>} : vector<8x16xf32>, vector<16x64xf32>, vector<8x64xf32> -> vector<8x64xf32>
    %104 = arith.addf %101, %103 : vector<8x64xf32>
    %105 = vector.extract_strided_slice %104 {offsets = [0, 0], sizes = [8, 16], strides = [1, 1]} : vector<8x64xf32> to vector<8x16xf32>
    %106 = arith.negf %105 : vector<8x16xf32>
    %107 = math.exp %106 : vector<8x16xf32>
    %cst_30 = arith.constant 1.000000e+00 : f32
    %108 = vector.broadcast %cst_30 : f32 to vector<8x16xf32>
    %109 = arith.addf %108, %107 : vector<8x16xf32>
    %110 = arith.divf %108, %109 : vector<8x16xf32>
    %111 = vector.extract_strided_slice %104 {offsets = [0, 16], sizes = [8, 16], strides = [1, 1]} : vector<8x64xf32> to vector<8x16xf32>
    %112 = arith.negf %111 : vector<8x16xf32>
    %113 = math.exp %112 : vector<8x16xf32>
    %cst_31 = arith.constant 1.000000e+00 : f32
    %114 = vector.broadcast %cst_31 : f32 to vector<8x16xf32>
    %115 = arith.addf %114, %113 : vector<8x16xf32>
    %116 = arith.divf %114, %115 : vector<8x16xf32>
    %117 = vector.extract_strided_slice %104 {offsets = [0, 32], sizes = [8, 16], strides = [1, 1]} : vector<8x64xf32> to vector<8x16xf32>
    %118 = math.tanh %117 : vector<8x16xf32>
    %119 = vector.extract_strided_slice %104 {offsets = [0, 48], sizes = [8, 16], strides = [1, 1]} : vector<8x64xf32> to vector<8x16xf32>
    %120 = arith.negf %119 : vector<8x16xf32>
    %121 = math.exp %120 : vector<8x16xf32>
    %cst_32 = arith.constant 1.000000e+00 : f32
    %122 = vector.broadcast %cst_32 : f32 to vector<8x16xf32>
    %123 = arith.addf %122, %121 : vector<8x16xf32>
    %124 = arith.divf %122, %123 : vector<8x16xf32>
    %125 = arith.mulf %116, %97 : vector<8x16xf32>
    %126 = arith.mulf %110, %118 : vector<8x16xf32>
    %127 = arith.addf %125, %126 : vector<8x16xf32>
    %128 = math.tanh %127 : vector<8x16xf32>
    %129 = arith.mulf %124, %128 : vector<8x16xf32>
    %130 = arith.addf %100, %129 : vector<8x16xf32>
    %131 = vector.extract_strided_slice %7 {offsets = [32, 0], sizes = [8, 64], strides = [1, 1]} : vector<64x64xf32> to vector<8x64xf32>
    %c0_33 = arith.constant 0 : index
    %c0_34 = arith.constant 0 : index
    %132 = vector.load %arg3[%c0_33, %c0_34] : memref<16x64xf32, #tpu.memory_space<vmem>>, vector<16x64xf32>
    %cst_35 = arith.constant dense<0.000000e+00> : vector<8x64xf32>
    %133 = tpu.matmul %129, %132, %cst_35 {dimension_numbers = #tpu.dot_dimension_numbers<[1], [0], [0], [1], [0, 0, 1, 1], [], []>} : vector<8x16xf32>, vector<16x64xf32>, vector<8x64xf32> -> vector<8x64xf32>
    %134 = arith.addf %131, %133 : vector<8x64xf32>
    %135 = vector.extract_strided_slice %134 {offsets = [0, 0], sizes = [8, 16], strides = [1, 1]} : vector<8x64xf32> to vector<8x16xf32>
    %136 = arith.negf %135 : vector<8x16xf32>
    %137 = math.exp %136 : vector<8x16xf32>
    %cst_36 = arith.constant 1.000000e+00 : f32
    %138 = vector.broadcast %cst_36 : f32 to vector<8x16xf32>
    %139 = arith.addf %138, %137 : vector<8x16xf32>
    %140 = arith.divf %138, %139 : vector<8x16xf32>
    %141 = vector.extract_strided_slice %134 {offsets = [0, 16], sizes = [8, 16], strides = [1, 1]} : vector<8x64xf32> to vector<8x16xf32>
    %142 = arith.negf %141 : vector<8x16xf32>
    %143 = math.exp %142 : vector<8x16xf32>
    %cst_37 = arith.constant 1.000000e+00 : f32
    %144 = vector.broadcast %cst_37 : f32 to vector<8x16xf32>
    %145 = arith.addf %144, %143 : vector<8x16xf32>
    %146 = arith.divf %144, %145 : vector<8x16xf32>
    %147 = vector.extract_strided_slice %134 {offsets = [0, 32], sizes = [8, 16], strides = [1, 1]} : vector<8x64xf32> to vector<8x16xf32>
    %148 = math.tanh %147 : vector<8x16xf32>
    %149 = vector.extract_strided_slice %134 {offsets = [0, 48], sizes = [8, 16], strides = [1, 1]} : vector<8x64xf32> to vector<8x16xf32>
    %150 = arith.negf %149 : vector<8x16xf32>
    %151 = math.exp %150 : vector<8x16xf32>
    %cst_38 = arith.constant 1.000000e+00 : f32
    %152 = vector.broadcast %cst_38 : f32 to vector<8x16xf32>
    %153 = arith.addf %152, %151 : vector<8x16xf32>
    %154 = arith.divf %152, %153 : vector<8x16xf32>
    %155 = arith.mulf %146, %127 : vector<8x16xf32>
    %156 = arith.mulf %140, %148 : vector<8x16xf32>
    %157 = arith.addf %155, %156 : vector<8x16xf32>
    %158 = math.tanh %157 : vector<8x16xf32>
    %159 = arith.mulf %154, %158 : vector<8x16xf32>
    %160 = arith.addf %130, %159 : vector<8x16xf32>
    %161 = vector.extract_strided_slice %7 {offsets = [40, 0], sizes = [8, 64], strides = [1, 1]} : vector<64x64xf32> to vector<8x64xf32>
    %c0_39 = arith.constant 0 : index
    %c0_40 = arith.constant 0 : index
    %162 = vector.load %arg3[%c0_39, %c0_40] : memref<16x64xf32, #tpu.memory_space<vmem>>, vector<16x64xf32>
    %cst_41 = arith.constant dense<0.000000e+00> : vector<8x64xf32>
    %163 = tpu.matmul %159, %162, %cst_41 {dimension_numbers = #tpu.dot_dimension_numbers<[1], [0], [0], [1], [0, 0, 1, 1], [], []>} : vector<8x16xf32>, vector<16x64xf32>, vector<8x64xf32> -> vector<8x64xf32>
    %164 = arith.addf %161, %163 : vector<8x64xf32>
    %165 = vector.extract_strided_slice %164 {offsets = [0, 0], sizes = [8, 16], strides = [1, 1]} : vector<8x64xf32> to vector<8x16xf32>
    %166 = arith.negf %165 : vector<8x16xf32>
    %167 = math.exp %166 : vector<8x16xf32>
    %cst_42 = arith.constant 1.000000e+00 : f32
    %168 = vector.broadcast %cst_42 : f32 to vector<8x16xf32>
    %169 = arith.addf %168, %167 : vector<8x16xf32>
    %170 = arith.divf %168, %169 : vector<8x16xf32>
    %171 = vector.extract_strided_slice %164 {offsets = [0, 16], sizes = [8, 16], strides = [1, 1]} : vector<8x64xf32> to vector<8x16xf32>
    %172 = arith.negf %171 : vector<8x16xf32>
    %173 = math.exp %172 : vector<8x16xf32>
    %cst_43 = arith.constant 1.000000e+00 : f32
    %174 = vector.broadcast %cst_43 : f32 to vector<8x16xf32>
    %175 = arith.addf %174, %173 : vector<8x16xf32>
    %176 = arith.divf %174, %175 : vector<8x16xf32>
    %177 = vector.extract_strided_slice %164 {offsets = [0, 32], sizes = [8, 16], strides = [1, 1]} : vector<8x64xf32> to vector<8x16xf32>
    %178 = math.tanh %177 : vector<8x16xf32>
    %179 = vector.extract_strided_slice %164 {offsets = [0, 48], sizes = [8, 16], strides = [1, 1]} : vector<8x64xf32> to vector<8x16xf32>
    %180 = arith.negf %179 : vector<8x16xf32>
    %181 = math.exp %180 : vector<8x16xf32>
    %cst_44 = arith.constant 1.000000e+00 : f32
    %182 = vector.broadcast %cst_44 : f32 to vector<8x16xf32>
    %183 = arith.addf %182, %181 : vector<8x16xf32>
    %184 = arith.divf %182, %183 : vector<8x16xf32>
    %185 = arith.mulf %176, %157 : vector<8x16xf32>
    %186 = arith.mulf %170, %178 : vector<8x16xf32>
    %187 = arith.addf %185, %186 : vector<8x16xf32>
    %188 = math.tanh %187 : vector<8x16xf32>
    %189 = arith.mulf %184, %188 : vector<8x16xf32>
    %190 = arith.addf %160, %189 : vector<8x16xf32>
    %191 = vector.extract_strided_slice %7 {offsets = [48, 0], sizes = [8, 64], strides = [1, 1]} : vector<64x64xf32> to vector<8x64xf32>
    %c0_45 = arith.constant 0 : index
    %c0_46 = arith.constant 0 : index
    %192 = vector.load %arg3[%c0_45, %c0_46] : memref<16x64xf32, #tpu.memory_space<vmem>>, vector<16x64xf32>
    %cst_47 = arith.constant dense<0.000000e+00> : vector<8x64xf32>
    %193 = tpu.matmul %189, %192, %cst_47 {dimension_numbers = #tpu.dot_dimension_numbers<[1], [0], [0], [1], [0, 0, 1, 1], [], []>} : vector<8x16xf32>, vector<16x64xf32>, vector<8x64xf32> -> vector<8x64xf32>
    %194 = arith.addf %191, %193 : vector<8x64xf32>
    %195 = vector.extract_strided_slice %194 {offsets = [0, 0], sizes = [8, 16], strides = [1, 1]} : vector<8x64xf32> to vector<8x16xf32>
    %196 = arith.negf %195 : vector<8x16xf32>
    %197 = math.exp %196 : vector<8x16xf32>
    %cst_48 = arith.constant 1.000000e+00 : f32
    %198 = vector.broadcast %cst_48 : f32 to vector<8x16xf32>
    %199 = arith.addf %198, %197 : vector<8x16xf32>
    %200 = arith.divf %198, %199 : vector<8x16xf32>
    %201 = vector.extract_strided_slice %194 {offsets = [0, 16], sizes = [8, 16], strides = [1, 1]} : vector<8x64xf32> to vector<8x16xf32>
    %202 = arith.negf %201 : vector<8x16xf32>
    %203 = math.exp %202 : vector<8x16xf32>
    %cst_49 = arith.constant 1.000000e+00 : f32
    %204 = vector.broadcast %cst_49 : f32 to vector<8x16xf32>
    %205 = arith.addf %204, %203 : vector<8x16xf32>
    %206 = arith.divf %204, %205 : vector<8x16xf32>
    %207 = vector.extract_strided_slice %194 {offsets = [0, 32], sizes = [8, 16], strides = [1, 1]} : vector<8x64xf32> to vector<8x16xf32>
    %208 = math.tanh %207 : vector<8x16xf32>
    %209 = vector.extract_strided_slice %194 {offsets = [0, 48], sizes = [8, 16], strides = [1, 1]} : vector<8x64xf32> to vector<8x16xf32>
    %210 = arith.negf %209 : vector<8x16xf32>
    %211 = math.exp %210 : vector<8x16xf32>
    %cst_50 = arith.constant 1.000000e+00 : f32
    %212 = vector.broadcast %cst_50 : f32 to vector<8x16xf32>
    %213 = arith.addf %212, %211 : vector<8x16xf32>
    %214 = arith.divf %212, %213 : vector<8x16xf32>
    %215 = arith.mulf %206, %187 : vector<8x16xf32>
    %216 = arith.mulf %200, %208 : vector<8x16xf32>
    %217 = arith.addf %215, %216 : vector<8x16xf32>
    %218 = math.tanh %217 : vector<8x16xf32>
    %219 = arith.mulf %214, %218 : vector<8x16xf32>
    %220 = arith.addf %190, %219 : vector<8x16xf32>
    %221 = vector.extract_strided_slice %7 {offsets = [56, 0], sizes = [8, 64], strides = [1, 1]} : vector<64x64xf32> to vector<8x64xf32>
    %c0_51 = arith.constant 0 : index
    %c0_52 = arith.constant 0 : index
    %222 = vector.load %arg3[%c0_51, %c0_52] : memref<16x64xf32, #tpu.memory_space<vmem>>, vector<16x64xf32>
    %cst_53 = arith.constant dense<0.000000e+00> : vector<8x64xf32>
    %223 = tpu.matmul %219, %222, %cst_53 {dimension_numbers = #tpu.dot_dimension_numbers<[1], [0], [0], [1], [0, 0, 1, 1], [], []>} : vector<8x16xf32>, vector<16x64xf32>, vector<8x64xf32> -> vector<8x64xf32>
    %224 = arith.addf %221, %223 : vector<8x64xf32>
    %225 = vector.extract_strided_slice %224 {offsets = [0, 0], sizes = [8, 16], strides = [1, 1]} : vector<8x64xf32> to vector<8x16xf32>
    %226 = arith.negf %225 : vector<8x16xf32>
    %227 = math.exp %226 : vector<8x16xf32>
    %cst_54 = arith.constant 1.000000e+00 : f32
    %228 = vector.broadcast %cst_54 : f32 to vector<8x16xf32>
    %229 = arith.addf %228, %227 : vector<8x16xf32>
    %230 = arith.divf %228, %229 : vector<8x16xf32>
    %231 = vector.extract_strided_slice %224 {offsets = [0, 16], sizes = [8, 16], strides = [1, 1]} : vector<8x64xf32> to vector<8x16xf32>
    %232 = arith.negf %231 : vector<8x16xf32>
    %233 = math.exp %232 : vector<8x16xf32>
    %cst_55 = arith.constant 1.000000e+00 : f32
    %234 = vector.broadcast %cst_55 : f32 to vector<8x16xf32>
    %235 = arith.addf %234, %233 : vector<8x16xf32>
    %236 = arith.divf %234, %235 : vector<8x16xf32>
    %237 = vector.extract_strided_slice %224 {offsets = [0, 32], sizes = [8, 16], strides = [1, 1]} : vector<8x64xf32> to vector<8x16xf32>
    %238 = math.tanh %237 : vector<8x16xf32>
    %239 = vector.extract_strided_slice %224 {offsets = [0, 48], sizes = [8, 16], strides = [1, 1]} : vector<8x64xf32> to vector<8x16xf32>
    %240 = arith.negf %239 : vector<8x16xf32>
    %241 = math.exp %240 : vector<8x16xf32>
    %cst_56 = arith.constant 1.000000e+00 : f32
    %242 = vector.broadcast %cst_56 : f32 to vector<8x16xf32>
    %243 = arith.addf %242, %241 : vector<8x16xf32>
    %244 = arith.divf %242, %243 : vector<8x16xf32>
    %245 = arith.mulf %236, %217 : vector<8x16xf32>
    %246 = arith.mulf %230, %238 : vector<8x16xf32>
    %247 = arith.addf %245, %246 : vector<8x16xf32>
    %248 = math.tanh %247 : vector<8x16xf32>
    %249 = arith.mulf %244, %248 : vector<8x16xf32>
    %250 = arith.addf %220, %249 : vector<8x16xf32>
    %cst_57 = arith.constant 1.250000e-01 : f32
    %251 = vector.broadcast %cst_57 : f32 to vector<8x16xf32>
    %252 = arith.mulf %250, %251 : vector<8x16xf32>
    %c0_58 = arith.constant 0 : index
    %c0_59 = arith.constant 0 : index
    %253 = vector.load %arg5[%c0_58, %c0_59] : memref<1x16xf32, #tpu.memory_space<vmem>>, vector<1x16xf32>
    %254 = vector.broadcast %253 : vector<1x16xf32> to vector<8x16xf32>
    %255 = arith.mulf %252, %254 : vector<8x16xf32>
    %cst_60 = arith.constant dense<0.000000e+00> : vector<8xf32>
    %256 = vector.multi_reduction <add>, %255, %cst_60 [1] : vector<8x16xf32> to vector<8xf32>
    %257 = vector.shape_cast %256 : vector<8xf32> to vector<8x1xf32>
    %c0_61 = arith.constant 0 : index
    %c0_62 = arith.constant 0 : index
    %258 = vector.load %arg7[%c0_61, %c0_62] : memref<1x1xf32, #tpu.memory_space<vmem>>, vector<1x1xf32>
    %259 = vector.broadcast %258 : vector<1x1xf32> to vector<8x1xf32>
    %260 = arith.addf %257, %259 : vector<8x1xf32>
    %c0_63 = arith.constant 0 : index
    %c0_64 = arith.constant 0 : index
    %261 = vector.load %arg1[%c0_63, %c0_64] : memref<8x8xf32, #tpu.memory_space<vmem>>, vector<8x8xf32>
    %c0_65 = arith.constant 0 : index
    %c0_66 = arith.constant 0 : index
    %262 = vector.load %arg6[%c0_65, %c0_66] : memref<1x1xf32, #tpu.memory_space<vmem>>, vector<1x1xf32>
    %263 = vector.broadcast %262 : vector<1x1xf32> to vector<8x8xf32>
    %264 = arith.mulf %261, %263 : vector<8x8xf32>
    %265 = vector.broadcast %260 : vector<8x1xf32> to vector<8x8xf32>
    %266 = arith.addf %265, %264 : vector<8x8xf32>
    %cst_67 = arith.constant 0.000000e+00 : f32
    %267 = vector.broadcast %cst_67 : f32 to vector<8x16xf32>
    %cst_68 = arith.constant 0.000000e+00 : f32
    %268 = vector.broadcast %cst_68 : f32 to vector<8x16xf32>
    %269 = vector.extract_strided_slice %266 {offsets = [0, 0], sizes = [8, 1], strides = [1, 1]} : vector<8x8xf32> to vector<8x1xf32>
    %c0_69 = arith.constant 0 : index
    %c0_70 = arith.constant 0 : index
    %270 = vector.load %arg8[%c0_69, %c0_70] : memref<1x64xf32, #tpu.memory_space<vmem>>, vector<1x64xf32>
    %271 = vector.broadcast %269 : vector<8x1xf32> to vector<8x64xf32>
    %272 = vector.broadcast %270 : vector<1x64xf32> to vector<8x64xf32>
    %273 = arith.mulf %271, %272 : vector<8x64xf32>
    %c0_71 = arith.constant 0 : index
    %c0_72 = arith.constant 0 : index
    %274 = vector.load %arg9[%c0_71, %c0_72] : memref<16x64xf32, #tpu.memory_space<vmem>>, vector<16x64xf32>
    %cst_73 = arith.constant dense<0.000000e+00> : vector<8x64xf32>
    %275 = tpu.matmul %267, %274, %cst_73 {dimension_numbers = #tpu.dot_dimension_numbers<[1], [0], [0], [1], [0, 0, 1, 1], [], []>} : vector<8x16xf32>, vector<16x64xf32>, vector<8x64xf32> -> vector<8x64xf32>
    %276 = arith.addf %273, %275 : vector<8x64xf32>
    %c0_74 = arith.constant 0 : index
    %c0_75 = arith.constant 0 : index
    %277 = vector.load %arg10[%c0_74, %c0_75] : memref<1x64xf32, #tpu.memory_space<vmem>>, vector<1x64xf32>
    %278 = vector.broadcast %277 : vector<1x64xf32> to vector<8x64xf32>
    %279 = arith.addf %276, %278 : vector<8x64xf32>
    %280 = vector.extract_strided_slice %279 {offsets = [0, 0], sizes = [8, 16], strides = [1, 1]} : vector<8x64xf32> to vector<8x16xf32>
    %281 = arith.negf %280 : vector<8x16xf32>
    %282 = math.exp %281 : vector<8x16xf32>
    %cst_76 = arith.constant 1.000000e+00 : f32
    %283 = vector.broadcast %cst_76 : f32 to vector<8x16xf32>
    %284 = arith.addf %283, %282 : vector<8x16xf32>
    %285 = arith.divf %283, %284 : vector<8x16xf32>
    %286 = vector.extract_strided_slice %279 {offsets = [0, 16], sizes = [8, 16], strides = [1, 1]} : vector<8x64xf32> to vector<8x16xf32>
    %287 = arith.negf %286 : vector<8x16xf32>
    %288 = math.exp %287 : vector<8x16xf32>
    %cst_77 = arith.constant 1.000000e+00 : f32
    %289 = vector.broadcast %cst_77 : f32 to vector<8x16xf32>
    %290 = arith.addf %289, %288 : vector<8x16xf32>
    %291 = arith.divf %289, %290 : vector<8x16xf32>
    %292 = vector.extract_strided_slice %279 {offsets = [0, 32], sizes = [8, 16], strides = [1, 1]} : vector<8x64xf32> to vector<8x16xf32>
    %293 = math.tanh %292 : vector<8x16xf32>
    %294 = vector.extract_strided_slice %279 {offsets = [0, 48], sizes = [8, 16], strides = [1, 1]} : vector<8x64xf32> to vector<8x16xf32>
    %295 = arith.negf %294 : vector<8x16xf32>
    %296 = math.exp %295 : vector<8x16xf32>
    %cst_78 = arith.constant 1.000000e+00 : f32
    %297 = vector.broadcast %cst_78 : f32 to vector<8x16xf32>
    %298 = arith.addf %297, %296 : vector<8x16xf32>
    %299 = arith.divf %297, %298 : vector<8x16xf32>
    %300 = arith.mulf %291, %268 : vector<8x16xf32>
    %301 = arith.mulf %285, %293 : vector<8x16xf32>
    %302 = arith.addf %300, %301 : vector<8x16xf32>
    %303 = math.tanh %302 : vector<8x16xf32>
    %304 = arith.mulf %299, %303 : vector<8x16xf32>
    %305 = vector.extract_strided_slice %266 {offsets = [0, 1], sizes = [8, 1], strides = [1, 1]} : vector<8x8xf32> to vector<8x1xf32>
    %c0_79 = arith.constant 0 : index
    %c0_80 = arith.constant 0 : index
    %306 = vector.load %arg8[%c0_79, %c0_80] : memref<1x64xf32, #tpu.memory_space<vmem>>, vector<1x64xf32>
    %307 = vector.broadcast %305 : vector<8x1xf32> to vector<8x64xf32>
    %308 = vector.broadcast %306 : vector<1x64xf32> to vector<8x64xf32>
    %309 = arith.mulf %307, %308 : vector<8x64xf32>
    %c0_81 = arith.constant 0 : index
    %c0_82 = arith.constant 0 : index
    %310 = vector.load %arg9[%c0_81, %c0_82] : memref<16x64xf32, #tpu.memory_space<vmem>>, vector<16x64xf32>
    %cst_83 = arith.constant dense<0.000000e+00> : vector<8x64xf32>
    %311 = tpu.matmul %304, %310, %cst_83 {dimension_numbers = #tpu.dot_dimension_numbers<[1], [0], [0], [1], [0, 0, 1, 1], [], []>} : vector<8x16xf32>, vector<16x64xf32>, vector<8x64xf32> -> vector<8x64xf32>
    %312 = arith.addf %309, %311 : vector<8x64xf32>
    %c0_84 = arith.constant 0 : index
    %c0_85 = arith.constant 0 : index
    %313 = vector.load %arg10[%c0_84, %c0_85] : memref<1x64xf32, #tpu.memory_space<vmem>>, vector<1x64xf32>
    %314 = vector.broadcast %313 : vector<1x64xf32> to vector<8x64xf32>
    %315 = arith.addf %312, %314 : vector<8x64xf32>
    %316 = vector.extract_strided_slice %315 {offsets = [0, 0], sizes = [8, 16], strides = [1, 1]} : vector<8x64xf32> to vector<8x16xf32>
    %317 = arith.negf %316 : vector<8x16xf32>
    %318 = math.exp %317 : vector<8x16xf32>
    %cst_86 = arith.constant 1.000000e+00 : f32
    %319 = vector.broadcast %cst_86 : f32 to vector<8x16xf32>
    %320 = arith.addf %319, %318 : vector<8x16xf32>
    %321 = arith.divf %319, %320 : vector<8x16xf32>
    %322 = vector.extract_strided_slice %315 {offsets = [0, 16], sizes = [8, 16], strides = [1, 1]} : vector<8x64xf32> to vector<8x16xf32>
    %323 = arith.negf %322 : vector<8x16xf32>
    %324 = math.exp %323 : vector<8x16xf32>
    %cst_87 = arith.constant 1.000000e+00 : f32
    %325 = vector.broadcast %cst_87 : f32 to vector<8x16xf32>
    %326 = arith.addf %325, %324 : vector<8x16xf32>
    %327 = arith.divf %325, %326 : vector<8x16xf32>
    %328 = vector.extract_strided_slice %315 {offsets = [0, 32], sizes = [8, 16], strides = [1, 1]} : vector<8x64xf32> to vector<8x16xf32>
    %329 = math.tanh %328 : vector<8x16xf32>
    %330 = vector.extract_strided_slice %315 {offsets = [0, 48], sizes = [8, 16], strides = [1, 1]} : vector<8x64xf32> to vector<8x16xf32>
    %331 = arith.negf %330 : vector<8x16xf32>
    %332 = math.exp %331 : vector<8x16xf32>
    %cst_88 = arith.constant 1.000000e+00 : f32
    %333 = vector.broadcast %cst_88 : f32 to vector<8x16xf32>
    %334 = arith.addf %333, %332 : vector<8x16xf32>
    %335 = arith.divf %333, %334 : vector<8x16xf32>
    %336 = arith.mulf %327, %302 : vector<8x16xf32>
    %337 = arith.mulf %321, %329 : vector<8x16xf32>
    %338 = arith.addf %336, %337 : vector<8x16xf32>
    %339 = math.tanh %338 : vector<8x16xf32>
    %340 = arith.mulf %335, %339 : vector<8x16xf32>
    %341 = vector.extract_strided_slice %266 {offsets = [0, 2], sizes = [8, 1], strides = [1, 1]} : vector<8x8xf32> to vector<8x1xf32>
    %c0_89 = arith.constant 0 : index
    %c0_90 = arith.constant 0 : index
    %342 = vector.load %arg8[%c0_89, %c0_90] : memref<1x64xf32, #tpu.memory_space<vmem>>, vector<1x64xf32>
    %343 = vector.broadcast %341 : vector<8x1xf32> to vector<8x64xf32>
    %344 = vector.broadcast %342 : vector<1x64xf32> to vector<8x64xf32>
    %345 = arith.mulf %343, %344 : vector<8x64xf32>
    %c0_91 = arith.constant 0 : index
    %c0_92 = arith.constant 0 : index
    %346 = vector.load %arg9[%c0_91, %c0_92] : memref<16x64xf32, #tpu.memory_space<vmem>>, vector<16x64xf32>
    %cst_93 = arith.constant dense<0.000000e+00> : vector<8x64xf32>
    %347 = tpu.matmul %340, %346, %cst_93 {dimension_numbers = #tpu.dot_dimension_numbers<[1], [0], [0], [1], [0, 0, 1, 1], [], []>} : vector<8x16xf32>, vector<16x64xf32>, vector<8x64xf32> -> vector<8x64xf32>
    %348 = arith.addf %345, %347 : vector<8x64xf32>
    %c0_94 = arith.constant 0 : index
    %c0_95 = arith.constant 0 : index
    %349 = vector.load %arg10[%c0_94, %c0_95] : memref<1x64xf32, #tpu.memory_space<vmem>>, vector<1x64xf32>
    %350 = vector.broadcast %349 : vector<1x64xf32> to vector<8x64xf32>
    %351 = arith.addf %348, %350 : vector<8x64xf32>
    %352 = vector.extract_strided_slice %351 {offsets = [0, 0], sizes = [8, 16], strides = [1, 1]} : vector<8x64xf32> to vector<8x16xf32>
    %353 = arith.negf %352 : vector<8x16xf32>
    %354 = math.exp %353 : vector<8x16xf32>
    %cst_96 = arith.constant 1.000000e+00 : f32
    %355 = vector.broadcast %cst_96 : f32 to vector<8x16xf32>
    %356 = arith.addf %355, %354 : vector<8x16xf32>
    %357 = arith.divf %355, %356 : vector<8x16xf32>
    %358 = vector.extract_strided_slice %351 {offsets = [0, 16], sizes = [8, 16], strides = [1, 1]} : vector<8x64xf32> to vector<8x16xf32>
    %359 = arith.negf %358 : vector<8x16xf32>
    %360 = math.exp %359 : vector<8x16xf32>
    %cst_97 = arith.constant 1.000000e+00 : f32
    %361 = vector.broadcast %cst_97 : f32 to vector<8x16xf32>
    %362 = arith.addf %361, %360 : vector<8x16xf32>
    %363 = arith.divf %361, %362 : vector<8x16xf32>
    %364 = vector.extract_strided_slice %351 {offsets = [0, 32], sizes = [8, 16], strides = [1, 1]} : vector<8x64xf32> to vector<8x16xf32>
    %365 = math.tanh %364 : vector<8x16xf32>
    %366 = vector.extract_strided_slice %351 {offsets = [0, 48], sizes = [8, 16], strides = [1, 1]} : vector<8x64xf32> to vector<8x16xf32>
    %367 = arith.negf %366 : vector<8x16xf32>
    %368 = math.exp %367 : vector<8x16xf32>
    %cst_98 = arith.constant 1.000000e+00 : f32
    %369 = vector.broadcast %cst_98 : f32 to vector<8x16xf32>
    %370 = arith.addf %369, %368 : vector<8x16xf32>
    %371 = arith.divf %369, %370 : vector<8x16xf32>
    %372 = arith.mulf %363, %338 : vector<8x16xf32>
    %373 = arith.mulf %357, %365 : vector<8x16xf32>
    %374 = arith.addf %372, %373 : vector<8x16xf32>
    %375 = math.tanh %374 : vector<8x16xf32>
    %376 = arith.mulf %371, %375 : vector<8x16xf32>
    %377 = vector.extract_strided_slice %266 {offsets = [0, 3], sizes = [8, 1], strides = [1, 1]} : vector<8x8xf32> to vector<8x1xf32>
    %c0_99 = arith.constant 0 : index
    %c0_100 = arith.constant 0 : index
    %378 = vector.load %arg8[%c0_99, %c0_100] : memref<1x64xf32, #tpu.memory_space<vmem>>, vector<1x64xf32>
    %379 = vector.broadcast %377 : vector<8x1xf32> to vector<8x64xf32>
    %380 = vector.broadcast %378 : vector<1x64xf32> to vector<8x64xf32>
    %381 = arith.mulf %379, %380 : vector<8x64xf32>
    %c0_101 = arith.constant 0 : index
    %c0_102 = arith.constant 0 : index
    %382 = vector.load %arg9[%c0_101, %c0_102] : memref<16x64xf32, #tpu.memory_space<vmem>>, vector<16x64xf32>
    %cst_103 = arith.constant dense<0.000000e+00> : vector<8x64xf32>
    %383 = tpu.matmul %376, %382, %cst_103 {dimension_numbers = #tpu.dot_dimension_numbers<[1], [0], [0], [1], [0, 0, 1, 1], [], []>} : vector<8x16xf32>, vector<16x64xf32>, vector<8x64xf32> -> vector<8x64xf32>
    %384 = arith.addf %381, %383 : vector<8x64xf32>
    %c0_104 = arith.constant 0 : index
    %c0_105 = arith.constant 0 : index
    %385 = vector.load %arg10[%c0_104, %c0_105] : memref<1x64xf32, #tpu.memory_space<vmem>>, vector<1x64xf32>
    %386 = vector.broadcast %385 : vector<1x64xf32> to vector<8x64xf32>
    %387 = arith.addf %384, %386 : vector<8x64xf32>
    %388 = vector.extract_strided_slice %387 {offsets = [0, 0], sizes = [8, 16], strides = [1, 1]} : vector<8x64xf32> to vector<8x16xf32>
    %389 = arith.negf %388 : vector<8x16xf32>
    %390 = math.exp %389 : vector<8x16xf32>
    %cst_106 = arith.constant 1.000000e+00 : f32
    %391 = vector.broadcast %cst_106 : f32 to vector<8x16xf32>
    %392 = arith.addf %391, %390 : vector<8x16xf32>
    %393 = arith.divf %391, %392 : vector<8x16xf32>
    %394 = vector.extract_strided_slice %387 {offsets = [0, 16], sizes = [8, 16], strides = [1, 1]} : vector<8x64xf32> to vector<8x16xf32>
    %395 = arith.negf %394 : vector<8x16xf32>
    %396 = math.exp %395 : vector<8x16xf32>
    %cst_107 = arith.constant 1.000000e+00 : f32
    %397 = vector.broadcast %cst_107 : f32 to vector<8x16xf32>
    %398 = arith.addf %397, %396 : vector<8x16xf32>
    %399 = arith.divf %397, %398 : vector<8x16xf32>
    %400 = vector.extract_strided_slice %387 {offsets = [0, 32], sizes = [8, 16], strides = [1, 1]} : vector<8x64xf32> to vector<8x16xf32>
    %401 = math.tanh %400 : vector<8x16xf32>
    %402 = vector.extract_strided_slice %387 {offsets = [0, 48], sizes = [8, 16], strides = [1, 1]} : vector<8x64xf32> to vector<8x16xf32>
    %403 = arith.negf %402 : vector<8x16xf32>
    %404 = math.exp %403 : vector<8x16xf32>
    %cst_108 = arith.constant 1.000000e+00 : f32
    %405 = vector.broadcast %cst_108 : f32 to vector<8x16xf32>
    %406 = arith.addf %405, %404 : vector<8x16xf32>
    %407 = arith.divf %405, %406 : vector<8x16xf32>
    %408 = arith.mulf %399, %374 : vector<8x16xf32>
    %409 = arith.mulf %393, %401 : vector<8x16xf32>
    %410 = arith.addf %408, %409 : vector<8x16xf32>
    %411 = math.tanh %410 : vector<8x16xf32>
    %412 = arith.mulf %407, %411 : vector<8x16xf32>
    %413 = vector.extract_strided_slice %266 {offsets = [0, 4], sizes = [8, 1], strides = [1, 1]} : vector<8x8xf32> to vector<8x1xf32>
    %c0_109 = arith.constant 0 : index
    %c0_110 = arith.constant 0 : index
    %414 = vector.load %arg8[%c0_109, %c0_110] : memref<1x64xf32, #tpu.memory_space<vmem>>, vector<1x64xf32>
    %415 = vector.broadcast %413 : vector<8x1xf32> to vector<8x64xf32>
    %416 = vector.broadcast %414 : vector<1x64xf32> to vector<8x64xf32>
    %417 = arith.mulf %415, %416 : vector<8x64xf32>
    %c0_111 = arith.constant 0 : index
    %c0_112 = arith.constant 0 : index
    %418 = vector.load %arg9[%c0_111, %c0_112] : memref<16x64xf32, #tpu.memory_space<vmem>>, vector<16x64xf32>
    %cst_113 = arith.constant dense<0.000000e+00> : vector<8x64xf32>
    %419 = tpu.matmul %412, %418, %cst_113 {dimension_numbers = #tpu.dot_dimension_numbers<[1], [0], [0], [1], [0, 0, 1, 1], [], []>} : vector<8x16xf32>, vector<16x64xf32>, vector<8x64xf32> -> vector<8x64xf32>
    %420 = arith.addf %417, %419 : vector<8x64xf32>
    %c0_114 = arith.constant 0 : index
    %c0_115 = arith.constant 0 : index
    %421 = vector.load %arg10[%c0_114, %c0_115] : memref<1x64xf32, #tpu.memory_space<vmem>>, vector<1x64xf32>
    %422 = vector.broadcast %421 : vector<1x64xf32> to vector<8x64xf32>
    %423 = arith.addf %420, %422 : vector<8x64xf32>
    %424 = vector.extract_strided_slice %423 {offsets = [0, 0], sizes = [8, 16], strides = [1, 1]} : vector<8x64xf32> to vector<8x16xf32>
    %425 = arith.negf %424 : vector<8x16xf32>
    %426 = math.exp %425 : vector<8x16xf32>
    %cst_116 = arith.constant 1.000000e+00 : f32
    %427 = vector.broadcast %cst_116 : f32 to vector<8x16xf32>
    %428 = arith.addf %427, %426 : vector<8x16xf32>
    %429 = arith.divf %427, %428 : vector<8x16xf32>
    %430 = vector.extract_strided_slice %423 {offsets = [0, 16], sizes = [8, 16], strides = [1, 1]} : vector<8x64xf32> to vector<8x16xf32>
    %431 = arith.negf %430 : vector<8x16xf32>
    %432 = math.exp %431 : vector<8x16xf32>
    %cst_117 = arith.constant 1.000000e+00 : f32
    %433 = vector.broadcast %cst_117 : f32 to vector<8x16xf32>
    %434 = arith.addf %433, %432 : vector<8x16xf32>
    %435 = arith.divf %433, %434 : vector<8x16xf32>
    %436 = vector.extract_strided_slice %423 {offsets = [0, 32], sizes = [8, 16], strides = [1, 1]} : vector<8x64xf32> to vector<8x16xf32>
    %437 = math.tanh %436 : vector<8x16xf32>
    %438 = vector.extract_strided_slice %423 {offsets = [0, 48], sizes = [8, 16], strides = [1, 1]} : vector<8x64xf32> to vector<8x16xf32>
    %439 = arith.negf %438 : vector<8x16xf32>
    %440 = math.exp %439 : vector<8x16xf32>
    %cst_118 = arith.constant 1.000000e+00 : f32
    %441 = vector.broadcast %cst_118 : f32 to vector<8x16xf32>
    %442 = arith.addf %441, %440 : vector<8x16xf32>
    %443 = arith.divf %441, %442 : vector<8x16xf32>
    %444 = arith.mulf %435, %410 : vector<8x16xf32>
    %445 = arith.mulf %429, %437 : vector<8x16xf32>
    %446 = arith.addf %444, %445 : vector<8x16xf32>
    %447 = math.tanh %446 : vector<8x16xf32>
    %448 = arith.mulf %443, %447 : vector<8x16xf32>
    %449 = vector.extract_strided_slice %266 {offsets = [0, 5], sizes = [8, 1], strides = [1, 1]} : vector<8x8xf32> to vector<8x1xf32>
    %c0_119 = arith.constant 0 : index
    %c0_120 = arith.constant 0 : index
    %450 = vector.load %arg8[%c0_119, %c0_120] : memref<1x64xf32, #tpu.memory_space<vmem>>, vector<1x64xf32>
    %451 = vector.broadcast %449 : vector<8x1xf32> to vector<8x64xf32>
    %452 = vector.broadcast %450 : vector<1x64xf32> to vector<8x64xf32>
    %453 = arith.mulf %451, %452 : vector<8x64xf32>
    %c0_121 = arith.constant 0 : index
    %c0_122 = arith.constant 0 : index
    %454 = vector.load %arg9[%c0_121, %c0_122] : memref<16x64xf32, #tpu.memory_space<vmem>>, vector<16x64xf32>
    %cst_123 = arith.constant dense<0.000000e+00> : vector<8x64xf32>
    %455 = tpu.matmul %448, %454, %cst_123 {dimension_numbers = #tpu.dot_dimension_numbers<[1], [0], [0], [1], [0, 0, 1, 1], [], []>} : vector<8x16xf32>, vector<16x64xf32>, vector<8x64xf32> -> vector<8x64xf32>
    %456 = arith.addf %453, %455 : vector<8x64xf32>
    %c0_124 = arith.constant 0 : index
    %c0_125 = arith.constant 0 : index
    %457 = vector.load %arg10[%c0_124, %c0_125] : memref<1x64xf32, #tpu.memory_space<vmem>>, vector<1x64xf32>
    %458 = vector.broadcast %457 : vector<1x64xf32> to vector<8x64xf32>
    %459 = arith.addf %456, %458 : vector<8x64xf32>
    %460 = vector.extract_strided_slice %459 {offsets = [0, 0], sizes = [8, 16], strides = [1, 1]} : vector<8x64xf32> to vector<8x16xf32>
    %461 = arith.negf %460 : vector<8x16xf32>
    %462 = math.exp %461 : vector<8x16xf32>
    %cst_126 = arith.constant 1.000000e+00 : f32
    %463 = vector.broadcast %cst_126 : f32 to vector<8x16xf32>
    %464 = arith.addf %463, %462 : vector<8x16xf32>
    %465 = arith.divf %463, %464 : vector<8x16xf32>
    %466 = vector.extract_strided_slice %459 {offsets = [0, 16], sizes = [8, 16], strides = [1, 1]} : vector<8x64xf32> to vector<8x16xf32>
    %467 = arith.negf %466 : vector<8x16xf32>
    %468 = math.exp %467 : vector<8x16xf32>
    %cst_127 = arith.constant 1.000000e+00 : f32
    %469 = vector.broadcast %cst_127 : f32 to vector<8x16xf32>
    %470 = arith.addf %469, %468 : vector<8x16xf32>
    %471 = arith.divf %469, %470 : vector<8x16xf32>
    %472 = vector.extract_strided_slice %459 {offsets = [0, 32], sizes = [8, 16], strides = [1, 1]} : vector<8x64xf32> to vector<8x16xf32>
    %473 = math.tanh %472 : vector<8x16xf32>
    %474 = vector.extract_strided_slice %459 {offsets = [0, 48], sizes = [8, 16], strides = [1, 1]} : vector<8x64xf32> to vector<8x16xf32>
    %475 = arith.negf %474 : vector<8x16xf32>
    %476 = math.exp %475 : vector<8x16xf32>
    %cst_128 = arith.constant 1.000000e+00 : f32
    %477 = vector.broadcast %cst_128 : f32 to vector<8x16xf32>
    %478 = arith.addf %477, %476 : vector<8x16xf32>
    %479 = arith.divf %477, %478 : vector<8x16xf32>
    %480 = arith.mulf %471, %446 : vector<8x16xf32>
    %481 = arith.mulf %465, %473 : vector<8x16xf32>
    %482 = arith.addf %480, %481 : vector<8x16xf32>
    %483 = math.tanh %482 : vector<8x16xf32>
    %484 = arith.mulf %479, %483 : vector<8x16xf32>
    %485 = vector.extract_strided_slice %266 {offsets = [0, 6], sizes = [8, 1], strides = [1, 1]} : vector<8x8xf32> to vector<8x1xf32>
    %c0_129 = arith.constant 0 : index
    %c0_130 = arith.constant 0 : index
    %486 = vector.load %arg8[%c0_129, %c0_130] : memref<1x64xf32, #tpu.memory_space<vmem>>, vector<1x64xf32>
    %487 = vector.broadcast %485 : vector<8x1xf32> to vector<8x64xf32>
    %488 = vector.broadcast %486 : vector<1x64xf32> to vector<8x64xf32>
    %489 = arith.mulf %487, %488 : vector<8x64xf32>
    %c0_131 = arith.constant 0 : index
    %c0_132 = arith.constant 0 : index
    %490 = vector.load %arg9[%c0_131, %c0_132] : memref<16x64xf32, #tpu.memory_space<vmem>>, vector<16x64xf32>
    %cst_133 = arith.constant dense<0.000000e+00> : vector<8x64xf32>
    %491 = tpu.matmul %484, %490, %cst_133 {dimension_numbers = #tpu.dot_dimension_numbers<[1], [0], [0], [1], [0, 0, 1, 1], [], []>} : vector<8x16xf32>, vector<16x64xf32>, vector<8x64xf32> -> vector<8x64xf32>
    %492 = arith.addf %489, %491 : vector<8x64xf32>
    %c0_134 = arith.constant 0 : index
    %c0_135 = arith.constant 0 : index
    %493 = vector.load %arg10[%c0_134, %c0_135] : memref<1x64xf32, #tpu.memory_space<vmem>>, vector<1x64xf32>
    %494 = vector.broadcast %493 : vector<1x64xf32> to vector<8x64xf32>
    %495 = arith.addf %492, %494 : vector<8x64xf32>
    %496 = vector.extract_strided_slice %495 {offsets = [0, 0], sizes = [8, 16], strides = [1, 1]} : vector<8x64xf32> to vector<8x16xf32>
    %497 = arith.negf %496 : vector<8x16xf32>
    %498 = math.exp %497 : vector<8x16xf32>
    %cst_136 = arith.constant 1.000000e+00 : f32
    %499 = vector.broadcast %cst_136 : f32 to vector<8x16xf32>
    %500 = arith.addf %499, %498 : vector<8x16xf32>
    %501 = arith.divf %499, %500 : vector<8x16xf32>
    %502 = vector.extract_strided_slice %495 {offsets = [0, 16], sizes = [8, 16], strides = [1, 1]} : vector<8x64xf32> to vector<8x16xf32>
    %503 = arith.negf %502 : vector<8x16xf32>
    %504 = math.exp %503 : vector<8x16xf32>
    %cst_137 = arith.constant 1.000000e+00 : f32
    %505 = vector.broadcast %cst_137 : f32 to vector<8x16xf32>
    %506 = arith.addf %505, %504 : vector<8x16xf32>
    %507 = arith.divf %505, %506 : vector<8x16xf32>
    %508 = vector.extract_strided_slice %495 {offsets = [0, 32], sizes = [8, 16], strides = [1, 1]} : vector<8x64xf32> to vector<8x16xf32>
    %509 = math.tanh %508 : vector<8x16xf32>
    %510 = vector.extract_strided_slice %495 {offsets = [0, 48], sizes = [8, 16], strides = [1, 1]} : vector<8x64xf32> to vector<8x16xf32>
    %511 = arith.negf %510 : vector<8x16xf32>
    %512 = math.exp %511 : vector<8x16xf32>
    %cst_138 = arith.constant 1.000000e+00 : f32
    %513 = vector.broadcast %cst_138 : f32 to vector<8x16xf32>
    %514 = arith.addf %513, %512 : vector<8x16xf32>
    %515 = arith.divf %513, %514 : vector<8x16xf32>
    %516 = arith.mulf %507, %482 : vector<8x16xf32>
    %517 = arith.mulf %501, %509 : vector<8x16xf32>
    %518 = arith.addf %516, %517 : vector<8x16xf32>
    %519 = math.tanh %518 : vector<8x16xf32>
    %520 = arith.mulf %515, %519 : vector<8x16xf32>
    %521 = vector.extract_strided_slice %266 {offsets = [0, 7], sizes = [8, 1], strides = [1, 1]} : vector<8x8xf32> to vector<8x1xf32>
    %c0_139 = arith.constant 0 : index
    %c0_140 = arith.constant 0 : index
    %522 = vector.load %arg8[%c0_139, %c0_140] : memref<1x64xf32, #tpu.memory_space<vmem>>, vector<1x64xf32>
    %523 = vector.broadcast %521 : vector<8x1xf32> to vector<8x64xf32>
    %524 = vector.broadcast %522 : vector<1x64xf32> to vector<8x64xf32>
    %525 = arith.mulf %523, %524 : vector<8x64xf32>
    %c0_141 = arith.constant 0 : index
    %c0_142 = arith.constant 0 : index
    %526 = vector.load %arg9[%c0_141, %c0_142] : memref<16x64xf32, #tpu.memory_space<vmem>>, vector<16x64xf32>
    %cst_143 = arith.constant dense<0.000000e+00> : vector<8x64xf32>
    %527 = tpu.matmul %520, %526, %cst_143 {dimension_numbers = #tpu.dot_dimension_numbers<[1], [0], [0], [1], [0, 0, 1, 1], [], []>} : vector<8x16xf32>, vector<16x64xf32>, vector<8x64xf32> -> vector<8x64xf32>
    %528 = arith.addf %525, %527 : vector<8x64xf32>
    %c0_144 = arith.constant 0 : index
    %c0_145 = arith.constant 0 : index
    %529 = vector.load %arg10[%c0_144, %c0_145] : memref<1x64xf32, #tpu.memory_space<vmem>>, vector<1x64xf32>
    %530 = vector.broadcast %529 : vector<1x64xf32> to vector<8x64xf32>
    %531 = arith.addf %528, %530 : vector<8x64xf32>
    %532 = vector.extract_strided_slice %531 {offsets = [0, 0], sizes = [8, 16], strides = [1, 1]} : vector<8x64xf32> to vector<8x16xf32>
    %533 = arith.negf %532 : vector<8x16xf32>
    %534 = math.exp %533 : vector<8x16xf32>
    %cst_146 = arith.constant 1.000000e+00 : f32
    %535 = vector.broadcast %cst_146 : f32 to vector<8x16xf32>
    %536 = arith.addf %535, %534 : vector<8x16xf32>
    %537 = arith.divf %535, %536 : vector<8x16xf32>
    %538 = vector.extract_strided_slice %531 {offsets = [0, 16], sizes = [8, 16], strides = [1, 1]} : vector<8x64xf32> to vector<8x16xf32>
    %539 = arith.negf %538 : vector<8x16xf32>
    %540 = math.exp %539 : vector<8x16xf32>
    %cst_147 = arith.constant 1.000000e+00 : f32
    %541 = vector.broadcast %cst_147 : f32 to vector<8x16xf32>
    %542 = arith.addf %541, %540 : vector<8x16xf32>
    %543 = arith.divf %541, %542 : vector<8x16xf32>
    %544 = vector.extract_strided_slice %531 {offsets = [0, 32], sizes = [8, 16], strides = [1, 1]} : vector<8x64xf32> to vector<8x16xf32>
    %545 = math.tanh %544 : vector<8x16xf32>
    %546 = vector.extract_strided_slice %531 {offsets = [0, 48], sizes = [8, 16], strides = [1, 1]} : vector<8x64xf32> to vector<8x16xf32>
    %547 = arith.negf %546 : vector<8x16xf32>
    %548 = math.exp %547 : vector<8x16xf32>
    %cst_148 = arith.constant 1.000000e+00 : f32
    %549 = vector.broadcast %cst_148 : f32 to vector<8x16xf32>
    %550 = arith.addf %549, %548 : vector<8x16xf32>
    %551 = arith.divf %549, %550 : vector<8x16xf32>
    %552 = arith.mulf %543, %518 : vector<8x16xf32>
    %553 = arith.mulf %537, %545 : vector<8x16xf32>
    %554 = arith.addf %552, %553 : vector<8x16xf32>
    %555 = math.tanh %554 : vector<8x16xf32>
    %556 = arith.mulf %551, %555 : vector<8x16xf32>
    %c0_149 = arith.constant 0 : index
    %c0_150 = arith.constant 0 : index
    %557 = vector.load %arg11[%c0_149, %c0_150] : memref<16x16xf32, #tpu.memory_space<vmem>>, vector<16x16xf32>
    %cst_151 = arith.constant dense<0.000000e+00> : vector<8x16xf32>
    %558 = tpu.matmul %556, %557, %cst_151 {dimension_numbers = #tpu.dot_dimension_numbers<[1], [0], [0], [1], [0, 0, 1, 1], [], []>} : vector<8x16xf32>, vector<16x16xf32>, vector<8x16xf32> -> vector<8x16xf32>
    %c0_152 = arith.constant 0 : index
    %c0_153 = arith.constant 0 : index
    %559 = vector.load %arg12[%c0_152, %c0_153] : memref<16x16xf32, #tpu.memory_space<vmem>>, vector<16x16xf32>
    %cst_154 = arith.constant dense<0.000000e+00> : vector<8x16xf32>
    %560 = tpu.matmul %252, %559, %cst_154 {dimension_numbers = #tpu.dot_dimension_numbers<[1], [0], [0], [1], [0, 0, 1, 1], [], []>} : vector<8x16xf32>, vector<16x16xf32>, vector<8x16xf32> -> vector<8x16xf32>
    %561 = arith.addf %558, %560 : vector<8x16xf32>
    %c0_155 = arith.constant 0 : index
    %c0_156 = arith.constant 0 : index
    %562 = vector.load %arg13[%c0_155, %c0_156] : memref<1x16xf32, #tpu.memory_space<vmem>>, vector<1x16xf32>
    %563 = vector.broadcast %562 : vector<1x16xf32> to vector<8x16xf32>
    %564 = arith.addf %561, %563 : vector<8x16xf32>
    %c0_157 = arith.constant 0 : index
    %c0_158 = arith.constant 0 : index
    %565 = vector.load %arg14[%c0_157, %c0_158] : memref<1x16xf32, #tpu.memory_space<vmem>>, vector<1x16xf32>
    %566 = vector.broadcast %565 : vector<1x16xf32> to vector<8x16xf32>
    %567 = arith.mulf %564, %566 : vector<8x16xf32>
    %cst_159 = arith.constant dense<0.000000e+00> : vector<8xf32>
    %568 = vector.multi_reduction <add>, %567, %cst_159 [1] : vector<8x16xf32> to vector<8xf32>
    %569 = vector.shape_cast %568 : vector<8xf32> to vector<8x1xf32>
    %c0_160 = arith.constant 0 : index
    %c0_161 = arith.constant 0 : index
    %570 = vector.load %arg15[%c0_160, %c0_161] : memref<1x1xf32, #tpu.memory_space<vmem>>, vector<1x1xf32>
    %571 = vector.broadcast %570 : vector<1x1xf32> to vector<8x1xf32>
    %572 = arith.addf %569, %571 : vector<8x1xf32>
    %c0_162 = arith.constant 0 : index
    %c0_163 = arith.constant 0 : index
    %573 = vector.load %arg16[%c0_162, %c0_163] : memref<8x1xf32, #tpu.memory_space<vmem>>, vector<8x1xf32>
    tpu.vector_store %arg16[%c0_162, %c0_163], %572 {strides = array<i32>} : memref<8x1xf32, #tpu.memory_space<vmem>>, vector<8x1xf32>,
    return
  }
}

</mosaic_0001>

<bundles_post_ra>
// kernel: tpu_custom_call.1
= control target key start
LH: loop header
LB: loop body
LE: loop exit
PB: predicated region body
PF: predicated region fallthrough
CT: control target
= control target key end

     0   :  { %v2571_v1 = vmov 0.0|0.0   ;;  %vm83_vm0 = vcmask 64512   ;;  %vm2572_vm1 = vmmov 0   ;;  %v2573_v4 = vmov 0.0   ;;  %s2574_s18 = smov 96   ;;  %s2576_s19 = smov 32   ;;  %s2977_s2 = inlined_call_operand.vmem [shape: f32[8,64], index: 2, kind: input, shape index: {}]   ;;  %s2978_s0 = inlined_call_operand.vmem [shape: f32[64,8], index: 0, kind: input, shape index: {}]   ;;  %s2979_s3 = inlined_call_operand.vmem [shape: f32[16,64], index: 3, kind: input, shape index: {}]   ;;  %s2980_s4 = inlined_call_operand.vmem [shape: f32[1,64], index: 4, kind: input, shape index: {}]   ;;  %s2981_s5 = inlined_call_operand.vmem [shape: f32[1,16], index: 5, kind: input, shape index: {}]   ;;  %s2982_s6 = inlined_call_operand.<no memory space> [shape: f32[1,1], index: 6, kind: input, shape index: {}]   ;;  %s2983_s7 = inlined_call_operand.<no memory space> [shape: f32[1,1], index: 7, kind: input, shape index: {}]   ;;  %s2984_s9 = inlined_call_operand.vmem [shape: f32[16,64], index: 9, kind: input, shape index: {}]   ;;  %s2985_s1 = inlined_call_operand.vmem [shape: f32[8,8], index: 1, kind: input, shape index: {}]   ;;  %s2986_s8 = inlined_call_operand.vmem [shape: f32[1,64], index: 8, kind: input, shape index: {}]   ;;  %s2987_s10 = inlined_call_operand.vmem [shape: f32[1,64], index: 10, kind: input, shape index: {}]   ;;  %s2988_s12 = inlined_call_operand.vmem [shape: f32[16,16], index: 12, kind: input, shape index: {}]   ;;  %s2989_s11 = inlined_call_operand.vmem [shape: f32[16,16], index: 11, kind: input, shape index: {}]   ;;  %s2990_s15 = inlined_call_operand.<no memory space> [shape: f32[1,1], index: 15, kind: input, shape index: {}]   ;;  %s2991_s13 = inlined_call_operand.vmem [shape: f32[1,16], index: 13, kind: input, shape index: {}]   ;;  %s2992_s14 = inlined_call_operand.vmem [shape: f32[1,16], index: 14, kind: input, shape index: {}]   ;;  %s2993_s16 = inlined_call_operand.vmem [shape: f32[8,1], index: 16, kind: output, shape index: {}]  }
   0x1   :  { %2994 = sst [smem:[#allocation5_spill]] %s2977_s2  ;;  %2365 = vmatprep.subr.bf16.mxu1 %v2571_v1  ;;  %v59_v2 = vld [vmem:[%s2978_s0] sm:$0xff]  ;;  %2243 = vmatprep.mubr.msk.f32.mxu1 %vm2572_vm1, %v2573_v4  ;;  %v214_v6 = vld [vmem:[%s2979_s3 + $0x8] sm:$0xff]  ;;  %s2577_s20 = smov 80   ;;  %vm215_vm2 = vcmask 130048   ;;  %v61_v45 = vld [vmem:[%s2978_s0 + $0x10] sm:$0xff] }
   0x2   :  { %s2995_s23 = sld [smem:[#allocation5_spill]]  ;;  %v213_v3 = vld [vmem:[%s2979_s3] sm:$0xff]  ;;  %v67_v5 = vmul.f32 0.125, %v59_v2  ;;  %v60_v7 = vld [vmem:[%s2978_s0 + $0x8] sm:$0xff]  ;;  %v62_v46 = vld [vmem:[%s2978_s0 + $0x18] sm:$0xff]  ;;  %v69_v47 = vmul.f32 0.125, %v61_v45 }
   0x3   :  { %v2690_v8 = vpack.c.bf16 %v214_v6, %v213_v3  ;;  %v68_v9 = vmul.f32 0.125, %v60_v7  ;;  %v2707_v10 = vld [vmem:[%s2980_s4] ss:$0 sm:$0xff]  ;;  %s2575_s4 = smov 16   ;;  %v70_v48 = vmul.f32 0.125, %v62_v46  ;;  %s2578_s21 = smov 48  }
   0x4   :  { %2227 = vmatprep.mubr.msk.f32.mxu0 %vm83_vm0, %v67_v5  ;;  %vm2107_vm3 = vcmask 7168  }
   0x5   :  { %2367 = vmatpush3.bf16.msra.mxu1 %v2690_v8 }
   0x6   :  { %2368 = vmatprep.subr.bf16.mxu1 %v2571_v1 }
   0x8   :  { %v75_v0 = vld [vmem:[%s2995_s23] sm:$0xff]  ;;  %2244 = vmatmul.mubr.f32.vlgmr.msra.gmra.mrb[0].mxu1 %v2573_v4 }
   0x9   :  { %2225 = vmatprep.subr.mxu0 %v75_v0  ;;  %2370 = vmatpush3.bf16.msra.mxu1 %v2690_v8 }
   0xa   :  { %2226 = vmatpush3.msra.mxu0 %v75_v0  ;;  %2250 = vmatprep.mubr.msk.f32.mxu1 %vm2572_vm1, %v2573_v4 }
   0xb   :  { %2377 = vmatprep.subr.bf16.mxu0 %v2571_v1  ;;  %2228 = vmatmul.mubr.msk.f32.vlgmr.msra.gmra.mrb[0].mxu0 %vm83_vm0, %v68_v9 }
   0xc   :  { %2379 = vmatpush3.bf16.msra.mxu0 %v2690_v8  ;;  %2371 = vmatprep.subr.bf16.mxu1 %v2571_v1 }
   0xd   :  { %2383 = vmatprep.subr.bf16.mxu0 %v2571_v1  ;;  %2230 = vmatprep.mubr.msk.f32.mxu0 %vm83_vm0, %v69_v47 }
   0xf   :  { %2231 = vmatmul.mubr.msk.f32.gmra.mrb[2].mxu0 %vm83_vm0, %v70_v48 }
  0xdb   :  { %v285_v14 = vpop.f32.mrb[0].mxu1 }
  0xdc   :  { %v2245_v16 = vpop.f32.mrb[1].mxu1 }
  0xde   :  { %v2229_v11 = vpop.f32.mrb[0].mxu0 }
  0xdf   :  { %v174_v12 = vpop.f32.mrb[1].mxu0  ;;  %v180_v31 = vadd.f32 %v2229_v11, %v2707_v10 }
  0xe0   :  { %v175_v13 = vadd.f32 %v2707_v10, %v174_v12 }
  0xe2   :  { %v289_v15 = vadd.f32 %v285_v14, %v175_v13  ;;  %v2232_v52 = vpop.f32.mrb[2].mxu0 }
  0xe3   :  { %v184_v53 = vpop.f32.mrb[3].mxu0 }
  0xe4   :  { %2443 = vtanh.f32 %v289_v15  ;;  %v2122_v18 = vmul.f32 -1.442695, %v289_v15  ;;  %v185_v55 = vadd.f32 %v2707_v10, %v184_v53  ;;  %v190_v15 = vadd.f32 %v2232_v52, %v2707_v10 }
  0xe6   :  { %2445 = vpow2.f32 %v2122_v18 }
  0xee   :  { %v2444_v17 = vpop.eup %2443 }
  0xef   :  { %299 = vrot.lane.b32.xlu0 %v2444_v17, %s2574_s18 }
  0xf0   :  { %v2446_v19 = vpop.eup %2445 }
  0xf1   :  { %v293_v20 = vadd.f32 1.0, %v2446_v19 }
  0xf3   :  { %2447 = vrcp.f32 %v293_v20 }
  0xfd   :  { %v2448_v21 = vpop.eup %2447 }
  0xfe   :  { %v297_v24 = vmul.f32 0.0, %v2448_v21 }
 0x161   :  { %v300_v22 = vpop.permute.xlu0 %299 }
 0x162   :  { %v302_v23 = vmul.f32 %v2448_v21, %v300_v22 }
 0x164   :  { %304 = vrot.lane.b32.xlu0 %v302_v23, %s2575_s4 }
 0x1d6   :  { %v305_v25 = vpop.permute.xlu0 %304 }
 0x1d7   :  { %v307_v26 = vadd.f32 %v305_v25, %v297_v24 }
 0x1d9   :  { %2449 = vtanh.f32 %v307_v26 }
 0x1e3   :  { %v2450_v27 = vpop.eup %2449 }
 0x1e4   :  { %310 = vrot.lane.b32.xlu1 %v2450_v27, %s2576_s19 }
 0x256   :  { %v311_v28 = vpop.permute.xlu1 %310 }
 0x257   :  { %v2713_v29 = vmul.f32 %v2448_v21, %v311_v28 }
 0x259   :  { %316 = vrot.lane.b32.xlu1 %v2713_v29, %s2577_s20 }
 0x2cb   :  { %v317_v30 = vpop.permute.xlu1 %316 }
 0x2cc   :  { %2251 = vmatmul.mubr.msk.f32.vlgmr.msra.gmra.mrb[2].mxu1 %vm215_vm2, %v317_v30  ;;  %v64_v30 = vld [vmem:[%s2978_s0 + $0x28] sm:$0xff] }
 0x2cd   :  { %2373 = vmatpush3.bf16.msra.mxu1 %v2690_v8  ;;  %2257 = vmatprep.mubr.msk.f32.mxu1 %vm2572_vm1, %v2573_v4 }
 0x2ce   :  { %2374 = vmatprep.subr.bf16.mxu1 %v2571_v1 }
 0x39f   :  { %v386_v32 = vpop.f32.mrb[2].mxu1 }
 0x3a0   :  { %v390_v33 = vadd.f32 %v386_v32, %v180_v31  ;;  %v2252_v34 = vpop.f32.mrb[3].mxu1  ;;  %v65_v31 = vld [vmem:[%s2978_s0 + $0x30] sm:$0xff] }
 0x3a1   :  { %v73_v34 = vmul.f32 0.125, %v65_v31 }
 0x3a2   :  { %2451 = vtanh.f32 %v390_v33  ;;  %v2124_v36 = vmul.f32 -1.442695, %v390_v33  ;;  %v72_v33 = vmul.f32 0.125, %v64_v30 }
 0x3a4   :  { %2453 = vpow2.f32 %v2124_v36 }
 0x3ac   :  { %v2452_v35 = vpop.eup %2451 }
 0x3ad   :  { %400 = vrot.lane.b32.xlu0 %v2452_v35, %s2574_s18  ;;  %v66_v35 = vld [vmem:[%s2978_s0 + $0x38] sm:$0xff] }
 0x3ae   :  { %v2454_v37 = vpop.eup %2453  ;;  %v74_v36 = vmul.f32 0.125, %v66_v35 }
 0x3af   :  { %v394_v38 = vadd.f32 1.0, %v2454_v37 }
 0x3b1   :  { %2455 = vrcp.f32 %v394_v38 }
 0x3bb   :  { %v2456_v39 = vpop.eup %2455 }
 0x3bc   :  { %v398_v42 = vmul.f32 %v2456_v39, %v307_v26 }
 0x41f   :  { %v401_v40 = vpop.permute.xlu0 %400 }
 0x420   :  { %v403_v41 = vmul.f32 %v2456_v39, %v401_v40 }
 0x422   :  { %405 = vrot.lane.b32.xlu1 %v403_v41, %s2575_s4 }
 0x494   :  { %v406_v43 = vpop.permute.xlu1 %405 }
 0x495   :  { %v408_v44 = vadd.f32 %v406_v43, %v398_v42 }
 0x497   :  { %2457 = vtanh.f32 %v408_v44 }
 0x4a1   :  { %v2458_v49 = vpop.eup %2457 }
 0x4a2   :  { %411 = vrot.lane.b32.xlu0 %v2458_v49, %s2576_s19 }
 0x514   :  { %v412_v50 = vpop.permute.xlu0 %411 }
 0x515   :  { %v414_v51 = vmul.f32 %v2456_v39, %v412_v50 }
 0x517   :  { %417 = vrot.lane.b32.xlu1 %v414_v51, %s2577_s20  ;;  %v415_v11 = vadd.f32 %v414_v51, %v2713_v29  ;;  %v63_v29 = vld [vmem:[%s2978_s0 + $0x20] sm:$0xff] }
 0x518   :  { %v71_v32 = vmul.f32 0.125, %v63_v29 }
 0x51a   :  { %2233 = vmatprep.mubr.msk.f32.mxu0 %vm83_vm0, %v71_v32 }
 0x51b   :  { %2234 = vmatmul.mubr.msk.f32.gmra.mrb[4].mxu0 %vm83_vm0, %v72_v33 }
 0x51c   :  { %2236 = vmatprep.mubr.msk.f32.mxu0 %vm83_vm0, %v73_v34 }
 0x51f   :  { %2237 = vmatmul.mubr.msk.f32.gmra.mrb[6].mxu0 %vm83_vm0, %v74_v36 }
 0x520   :  { %2271 = vmatprep.mubr.msk.f32.mxu0 %vm2572_vm1, %v2573_v4 }
 0x589   :  { %v418_v54 = vpop.permute.xlu1 %417 }
 0x58a   :  { %2258 = vmatmul.mubr.msk.f32.vlgmr.msra.gmra.mrb[4].mxu1 %vm215_vm2, %v418_v54 }
 0x58b   :  { %2376 = vmatpush3.bf16.msra.mxu1 %v2690_v8  ;;  %2264 = vmatprep.mubr.msk.f32.mxu1 %vm2572_vm1, %v2573_v4 }
 0x58c   :  { %2380 = vmatprep.subr.bf16.mxu1 %v2571_v1 }
 0x5ee   :  { %v2235_v41 = vpop.f32.mrb[4].mxu0 }
 0x5ef   :  { %v194_v42 = vpop.f32.mrb[5].mxu0 }
 0x5f0   :  { %v195_v46 = vadd.f32 %v2707_v10, %v194_v42 }
 0x5f2   :  { %v2774_v43 = vpop.f32.mrb[6].mxu0 }
 0x5f3   :  { %v210_v42 = vadd.f32 %v2774_v43, %v2707_v10 }
 0x65d   :  { %v487_v56 = vpop.f32.mrb[4].mxu1 }
 0x65e   :  { %v491_v57 = vadd.f32 %v487_v56, %v185_v55  ;;  %v2259_v58 = vpop.f32.mrb[5].mxu1 }
 0x660   :  { %2459 = vtanh.f32 %v491_v57  ;;  %v2126_v60 = vmul.f32 -1.442695, %v491_v57 }
 0x662   :  { %2461 = vpow2.f32 %v2126_v60 }
 0x66a   :  { %v2460_v59 = vpop.eup %2459 }
 0x66b   :  { %501 = vrot.lane.b32.xlu0 %v2460_v59, %s2574_s18 }
 0x66c   :  { %v2462_v61 = vpop.eup %2461 }
 0x66d   :  { %v495_v62 = vadd.f32 1.0, %v2462_v61 }
 0x66f   :  { %2463 = vrcp.f32 %v495_v62 }
 0x679   :  { %v2464_v63 = vpop.eup %2463 }
 0x67a   :  { %v499_v3 = vmul.f32 %v2464_v63, %v408_v44  ;;  %v2776_v44 = vpop.f32.mrb[7].mxu0 }
 0x6dd   :  { %v502_v0 = vpop.permute.xlu0 %501 }
 0x6de   :  { %v504_v2 = vmul.f32 %v2464_v63, %v502_v0 }
 0x6e0   :  { %506 = vrot.lane.b32.xlu1 %v504_v2, %s2575_s4  ;;  %v200_v2 = vadd.f32 %v2235_v41, %v2707_v10 }
 0x752   :  { %v507_v5 = vpop.permute.xlu1 %506 }
 0x753   :  { %v509_v6 = vadd.f32 %v507_v5, %v499_v3 }
 0x755   :  { %2465 = vtanh.f32 %v509_v6 }
 0x75f   :  { %v2466_v7 = vpop.eup %2465 }
 0x760   :  { %512 = vrot.lane.b32.xlu0 %v2466_v7, %s2576_s19 }
 0x7d2   :  { %v513_v9 = vpop.permute.xlu0 %512 }
 0x7d3   :  { %v515_v12 = vmul.f32 %v2464_v63, %v513_v9 }
 0x7d5   :  { %v516_v13 = vadd.f32 %v515_v12, %v415_v11  ;;  %518 = vrot.lane.b32.xlu1 %v515_v12, %s2577_s20 }
 0x847   :  { %v519_v14 = vpop.permute.xlu1 %518 }
 0x848   :  { %2265 = vmatmul.mubr.msk.f32.vlgmr.msra.gmra.mrb[6].mxu1 %vm215_vm2, %v519_v14 }
 0x849   :  { %2382 = vmatpush3.bf16.msra.mxu1 %v2690_v8  ;;  %2278 = vmatprep.mubr.msk.f32.mxu1 %vm2572_vm1, %v2573_v4 }
 0x84a   :  { %2386 = vmatprep.subr.bf16.mxu1 %v2571_v1 }
 0x91b   :  { %v588_v16 = vpop.f32.mrb[6].mxu1 }
 0x91c   :  { %v592_v17 = vadd.f32 %v588_v16, %v190_v15  ;;  %v2266_v18 = vpop.f32.mrb[7].mxu1 }
 0x91e   :  { %2467 = vtanh.f32 %v592_v17  ;;  %v2128_v20 = vmul.f32 -1.442695, %v592_v17 }
 0x920   :  { %2469 = vpow2.f32 %v2128_v20 }
 0x928   :  { %v2468_v19 = vpop.eup %2467 }
 0x929   :  { %602 = vrot.lane.b32.xlu0 %v2468_v19, %s2574_s18 }
 0x92a   :  { %v2470_v21 = vpop.eup %2469 }
 0x92b   :  { %v596_v22 = vadd.f32 1.0, %v2470_v21 }
 0x92d   :  { %2471 = vrcp.f32 %v596_v22 }
 0x937   :  { %v2472_v23 = vpop.eup %2471 }
 0x938   :  { %v600_v26 = vmul.f32 %v2472_v23, %v509_v6 }
 0x99b   :  { %v603_v24 = vpop.permute.xlu0 %602 }
 0x99c   :  { %v605_v25 = vmul.f32 %v2472_v23, %v603_v24 }
 0x99e   :  { %607 = vrot.lane.b32.xlu1 %v605_v25, %s2575_s4 }
 0xa10   :  { %v608_v27 = vpop.permute.xlu1 %607 }
 0xa11   :  { %v610_v28 = vadd.f32 %v608_v27, %v600_v26 }
 0xa13   :  { %2473 = vtanh.f32 %v610_v28 }
 0xa1d   :  { %v2474_v37 = vpop.eup %2473 }
 0xa1e   :  { %613 = vrot.lane.b32.xlu0 %v2474_v37, %s2576_s19 }
 0xa90   :  { %v614_v38 = vpop.permute.xlu0 %613 }
 0xa91   :  { %v616_v39 = vmul.f32 %v2472_v23, %v614_v38  ;;  %v205_v23 = vadd.f32 %v2707_v10, %v2776_v44  ;;  %v2137_v10 = vld [vmem:[%s2981_s5] ss:$0 sm:$0xff] }
 0xa93   :  { %v617_v40 = vadd.f32 %v616_v39, %v516_v13  ;;  %619 = vrot.lane.b32.xlu1 %v616_v39, %s2577_s20 }
 0xb05   :  { %v620_v45 = vpop.permute.xlu1 %619 }
 0xb06   :  { %2272 = vmatmul.mubr.msk.f32.vlgmr.msra.gmra.mrb[8].mxu0 %vm215_vm2, %v620_v45 }
 0xb07   :  { %2385 = vmatpush3.bf16.msra.mxu0 %v2690_v8  ;;  %2285 = vmatprep.mubr.msk.f32.mxu0 %vm2572_vm1, %v2573_v4 }
 0xb08   :  { %2389 = vmatprep.subr.bf16.mxu0 %v2571_v1 }
 0xbd9   :  { %v689_v47 = vpop.f32.mrb[8].mxu0 }
 0xbda   :  { %v693_v48 = vadd.f32 %v689_v47, %v195_v46  ;;  %v2273_v49 = vpop.f32.mrb[9].mxu0 }
 0xbdc   :  { %2475 = vtanh.f32 %v693_v48  ;;  %v2130_v51 = vmul.f32 -1.442695, %v693_v48 }
 0xbde   :  { %2477 = vpow2.f32 %v2130_v51 }
 0xbe6   :  { %v2476_v50 = vpop.eup %2475 }
 0xbe7   :  { %703 = vrot.lane.b32.xlu0 %v2476_v50, %s2574_s18 }
 0xbe8   :  { %v2478_v52 = vpop.eup %2477 }
 0xbe9   :  { %v697_v53 = vadd.f32 1.0, %v2478_v52 }
 0xbeb   :  { %2479 = vrcp.f32 %v697_v53 }
 0xbf5   :  { %v2480_v54 = vpop.eup %2479 }
 0xbf6   :  { %v701_v57 = vmul.f32 %v2480_v54, %v610_v28 }
 0xc59   :  { %v704_v55 = vpop.permute.xlu0 %703 }
 0xc5a   :  { %v706_v56 = vmul.f32 %v2480_v54, %v704_v55 }
 0xc5c   :  { %708 = vrot.lane.b32.xlu1 %v706_v56, %s2575_s4 }
 0xcce   :  { %v709_v58 = vpop.permute.xlu1 %708 }
 0xccf   :  { %v711_v59 = vadd.f32 %v709_v58, %v701_v57  ;;  %v2579_v57 = vmov 0   ;;  %v21_v58 = vstv %s2982_s6 }
 0xcd0   :  { %2435 = vset.pattern.permute.xlu0 %v2579_v57  ;;  %22 = vst [vmem:[#allocation2] sm:$0x1] %v21_v58 }
 0xcd1   :  { %2481 = vtanh.f32 %v711_v59 }
 0xcdb   :  { %v2482_v60 = vpop.eup %2481 }
 0xcdc   :  { %714 = vrot.lane.b32.xlu0 %v2482_v60, %s2576_s19 }
 0xd4e   :  { %v715_v61 = vpop.permute.xlu0 %714 }
 0xd4f   :  { %v717_v62 = vmul.f32 %v2480_v54, %v715_v61 }
 0xd51   :  { %v718_v63 = vadd.f32 %v717_v62, %v617_v40  ;;  %720 = vrot.lane.b32.xlu1 %v717_v62, %s2577_s20 }
 0xdc3   :  { %v721_v0 = vpop.permute.xlu1 %720 }
 0xdc4   :  { %2279 = vmatmul.mubr.msk.f32.vlgmr.msra.gmra.mrb[8].mxu1 %vm215_vm2, %v721_v0 }
 0xdc5   :  { %2388 = vmatpush3.bf16.msra.mxu1 %v2690_v8  ;;  %2292 = vmatprep.mubr.msk.f32.mxu1 %vm2572_vm1, %v2573_v4 }
 0xdc6   :  { %2392 = vmatprep.subr.bf16.mxu1 %v2571_v1 }
 0xe97   :  { %v790_v3 = vpop.f32.mrb[8].mxu1 }
 0xe98   :  { %v794_v5 = vadd.f32 %v790_v3, %v200_v2  ;;  %v2280_v6 = vpop.f32.mrb[9].mxu1  ;;  %v2139_v3 = vld [vmem:[#allocation2] ss:$0 sm:$0xff] }
 0xe9a   :  { %2483 = vtanh.f32 %v794_v5  ;;  %v2132_v9 = vmul.f32 -1.442695, %v794_v5 }
 0xe9c   :  { %2485 = vpow2.f32 %v2132_v9  ;;  %v1080_v9 = vld [vmem:[%s2984_s9 + $0x8] sm:$0xff] }
 0xea4   :  { %v2484_v7 = vpop.eup %2483 }
 0xea5   :  { %804 = vrot.lane.b32.xlu0 %v2484_v7, %s2574_s18  ;;  %v1079_v7 = vld [vmem:[%s2984_s9] sm:$0xff] }
 0xea6   :  { %v2486_v11 = vpop.eup %2485 }
 0xea7   :  { %v798_v12 = vadd.f32 1.0, %v2486_v11  ;;  %v2835_v11 = vpack.c.bf16 %v1080_v9, %v1079_v7 }
 0xea9   :  { %2487 = vrcp.f32 %v798_v12 }
 0xeb3   :  { %v2488_v8 = vpop.eup %2487 }
 0xeb4   :  { %v802_v15 = vmul.f32 %v2488_v8, %v711_v59  ;;  %v23_v59 = vstv %s2983_s7 }
 0xeb5   :  { %24 = vst [vmem:[#allocation3] sm:$0x1] %v23_v59 }
 0xebc   :  { %v2138_v12 = vld [vmem:[#allocation3] ss:$0 sm:$0xff] }
 0xf17   :  { %v805_v13 = vpop.permute.xlu0 %804 }
 0xf18   :  { %v807_v14 = vmul.f32 %v2488_v8, %v805_v13 }
 0xf1a   :  { %809 = vrot.lane.b32.xlu1 %v807_v14, %s2575_s4 }
 0xf8c   :  { %v810_v16 = vpop.permute.xlu1 %809 }
 0xf8d   :  { %v812_v17 = vadd.f32 %v810_v16, %v802_v15  ;;  %v1048_v15 = vld [vmem:[%s2985_s1] sm:$0xff] }
 0xf8f   :  { %2489 = vtanh.f32 %v812_v17 }
 0xf99   :  { %v2490_v18 = vpop.eup %2489 }
 0xf9a   :  { %815 = vrot.lane.b32.xlu0 %v2490_v18, %s2576_s19 }
0x100c   :  { %v816_v19 = vpop.permute.xlu0 %815 }
0x100d   :  { %v818_v20 = vmul.f32 %v2488_v8, %v816_v19 }
0x100f   :  { %v819_v21 = vadd.f32 %v818_v20, %v718_v63  ;;  %821 = vrot.lane.b32.xlu1 %v818_v20, %s2577_s20 }
0x1081   :  { %v822_v22 = vpop.permute.xlu1 %821 }
0x1082   :  { %2286 = vmatmul.mubr.msk.f32.vlgmr.msra.gmra.mrb[10].mxu0 %vm215_vm2, %v822_v22 }
0x1083   :  { %2299 = vmatprep.mubr.msk.f32.mxu0 %vm2572_vm1, %v2573_v4  ;;  %2391 = vmatpush3.bf16.msra.mxu0 %v2835_v11 }
0x1084   :  { %2395 = vmatprep.subr.bf16.mxu0 %v2571_v1 }
0x1086   :  { %2300 = vmatmul.mubr.f32.vlgmr.msra.gmra.mrb[12].mxu0 %v2573_v4 }
0x1087   :  { %2397 = vmatpush3.bf16.msra.mxu0 %v2835_v11  ;;  %2313 = vmatprep.mubr.msk.f32.mxu0 %vm2572_vm1, %v2573_v4 }
0x1088   :  { %2401 = vmatprep.subr.bf16.mxu0 %v2571_v1 }
0x1155   :  { %v891_v24 = vpop.f32.mrb[10].mxu0 }
0x1156   :  { %v895_v25 = vadd.f32 %v891_v24, %v205_v23  ;;  %v2287_v26 = vpop.f32.mrb[11].mxu0  ;;  %v2861_v24 = vld [vmem:[%s2987_s10] ss:$0 sm:$0xff] }
0x1158   :  { %2491 = vtanh.f32 %v895_v25  ;;  %v2134_v28 = vmul.f32 -1.442695, %v895_v25 }
0x1159   :  { %v1147_v19 = vpop.f32.mrb[12].mxu0 }
0x115a   :  { %2493 = vpow2.f32 %v2134_v28  ;;  %v2301_v20 = vpop.f32.mrb[13].mxu0 }
0x1162   :  { %v2492_v27 = vpop.eup %2491 }
0x1163   :  { %905 = vrot.lane.b32.xlu0 %v2492_v27, %s2574_s18 }
0x1164   :  { %v2494_v29 = vpop.eup %2493 }
0x1165   :  { %v899_v30 = vadd.f32 1.0, %v2494_v29 }
0x1167   :  { %2495 = vrcp.f32 %v899_v30 }
0x1171   :  { %v2496_v31 = vpop.eup %2495 }
0x1172   :  { %v903_v34 = vmul.f32 %v2496_v31, %v812_v17 }
0x11d5   :  { %v906_v32 = vpop.permute.xlu0 %905 }
0x11d6   :  { %v908_v33 = vmul.f32 %v2496_v31, %v906_v32 }
0x11d8   :  { %910 = vrot.lane.b32.xlu1 %v908_v33, %s2575_s4 }
0x124a   :  { %v911_v35 = vpop.permute.xlu1 %910 }
0x124b   :  { %v913_v36 = vadd.f32 %v911_v35, %v903_v34 }
0x124d   :  { %2497 = vtanh.f32 %v913_v36 }
0x1257   :  { %v2498_v37 = vpop.eup %2497 }
0x1258   :  { %916 = vrot.lane.b32.xlu0 %v2498_v37, %s2576_s19  ;;  %v2580_v37 = vmov 1  }
0x12ca   :  { %v917_v38 = vpop.permute.xlu0 %916 }
0x12cb   :  { %v919_v39 = vmul.f32 %v2496_v31, %v917_v38 }
0x12cd   :  { %v920_v40 = vadd.f32 %v919_v39, %v819_v21  ;;  %922 = vrot.lane.b32.xlu1 %v919_v39, %s2577_s20  ;;  %v2855_v21 = vld [vmem:[%s2986_s8] ss:$0 sm:$0xff] }
0x133f   :  { %v923_v41 = vpop.permute.xlu1 %922 }
0x1340   :  { %2293 = vmatmul.mubr.msk.f32.vlgmr.msra.gmra.mrb[10].mxu1 %vm215_vm2, %v923_v41 }
0x1341   :  { %2306 = vmatprep.mubr.msk.f32.mxu1 %vm2572_vm1, %v2573_v4  ;;  %2394 = vmatpush3.bf16.msra.mxu1 %v2835_v11 }
0x1342   :  { %2398 = vmatprep.subr.bf16.mxu1 %v2571_v1 }
0x1413   :  { %v992_v44 = vpop.f32.mrb[10].mxu1 }
0x1414   :  { %v996_v45 = vadd.f32 %v992_v44, %v210_v42  ;;  %v2294_v46 = vpop.f32.mrb[11].mxu1  ;;  %v2581_v42 = vmov 2  }
0x1415   :  { %2437 = vset.pattern.permute.xlu1 %v2581_v42 }
0x1416   :  { %2499 = vtanh.f32 %v996_v45  ;;  %v2136_v48 = vmul.f32 -1.442695, %v996_v45 }
0x1418   :  { %2501 = vpow2.f32 %v2136_v48 }
0x1420   :  { %v2500_v47 = vpop.eup %2499 }
0x1421   :  { %1006 = vrot.lane.b32.xlu0 %v2500_v47, %s2574_s18 }
0x1422   :  { %v2502_v49 = vpop.eup %2501 }
0x1423   :  { %v1000_v50 = vadd.f32 1.0, %v2502_v49 }
0x1425   :  { %2503 = vrcp.f32 %v1000_v50 }
0x142f   :  { %v2504_v51 = vpop.eup %2503 }
0x1430   :  { %v1004_v43 = vmul.f32 %v2504_v51, %v913_v36 }
0x1493   :  { %v1007_v52 = vpop.permute.xlu0 %1006 }
0x1494   :  { %v1009_v53 = vmul.f32 %v2504_v51, %v1007_v52 }
0x1496   :  { %1011 = vrot.lane.b32.xlu1 %v1009_v53, %s2575_s4 }
0x149a   :  { %1029 = vrot.lane.b32.xlu1 %v2137_v10, %s2578_s21 }
0x1508   :  { %v1012_v54 = vpop.permute.xlu1 %1011 }
0x1509   :  { %v1014_v55 = vadd.f32 %v1012_v54, %v1004_v43 }
0x150b   :  { %2505 = vtanh.f32 %v1014_v55 }
0x150c   :  { %v1030_v63 = vpop.permute.xlu1 %1029 }
0x1515   :  { %v2506_v56 = vpop.eup %2505 }
0x1516   :  { %1017 = vrot.lane.b32.xlu0 %v2506_v56, %s2576_s19 }
0x1588   :  { %v1018_v60 = vpop.permute.xlu0 %1017 }
0x1589   :  { %v1020_v61 = vmul.f32 %v2504_v51, %v1018_v60 }
0x158b   :  { %v1021_v62 = vadd.f32 %v1020_v61, %v920_v40 }
0x158d   :  { %v2824_v0 = vmul.f32 0.125, %v1021_v62 }
0x158f   :  { %v1032_v2 = vmul.f32 %v1030_v63, %v2824_v0 }
0x1591   :  { %1034 = vrot.lane.b32.xlu0 %v1032_v2, %s2577_s20 }
0x1595   :  { %1056 = vperm.xlu0 %2435, %v2139_v3  }
0x1603   :  { %v1035_v5 = vpop.permute.xlu0 %1034 }
0x1604   :  { %v1037_v6 = vsel %vm215_vm2, %v1035_v5, 0.0 }
0x1605   :  { %1038 = vadd.xlane.f32.xlu1 %v1037_v6 }
0x1614   :  { %v1057_v14 = vpop.permute.xlu0 %1056 }
0x1615   :  { %v1059_v16 = vmul.f32 %v1057_v14, %v1048_v15 }
0x1692   :  { %v1039_v8 = vpop.xlane.xlu1 %1038 }
0x1693   :  { %v1047_v13 = vadd.f32 %v2138_v12, %v1039_v8 }
0x1695   :  { %1062 = vperm.xlu0 %2435, %v1047_v13  }
0x1714   :  { %v1063_v17 = vpop.permute.xlu0 %1062 }
0x1715   :  { %v2849_v18 = vadd.f32 %v1063_v17, %v1059_v16  ;;  %v2582_v16 = vmov 3  }
0x1717   :  { %1069 = vperm.xlu0 %2435, %v2849_v18  }
0x171b   :  { %2436 = vset.pattern.permute.xlu0 %v2580_v37 }
0x1796   :  { %v1070_v22 = vpop.permute.xlu0 %1069 }
0x1797   :  { %v1078_v23 = vmul.f32 %v2855_v21, %v1070_v22 }
0x1799   :  { %v1151_v25 = vadd.f32 %v1147_v19, %v1078_v23 }
0x179b   :  { %v1159_v26 = vadd.f32 %v2861_v24, %v1151_v25 }
0x179d   :  { %2507 = vtanh.f32 %v1159_v26  ;;  %v2142_v28 = vmul.f32 -1.442695, %v1159_v26 }
0x179f   :  { %2509 = vpow2.f32 %v2142_v28 }
0x17a7   :  { %v2508_v27 = vpop.eup %2507 }
0x17a8   :  { %1169 = vrot.lane.b32.xlu0 %v2508_v27, %s2574_s18 }
0x17a9   :  { %v2510_v29 = vpop.eup %2509 }
0x17aa   :  { %v1163_v30 = vadd.f32 1.0, %v2510_v29 }
0x17ac   :  { %2511 = vrcp.f32 %v1163_v30 }
0x17b6   :  { %v2512_v31 = vpop.eup %2511 }
0x17b7   :  { %v1167_v34 = vmul.f32 0.0, %v2512_v31 }
0x181a   :  { %v1170_v32 = vpop.permute.xlu0 %1169 }
0x181b   :  { %v1172_v33 = vmul.f32 %v2512_v31, %v1170_v32 }
0x181d   :  { %1174 = vrot.lane.b32.xlu0 %v1172_v33, %s2575_s4 }
0x188f   :  { %v1175_v35 = vpop.permute.xlu0 %1174 }
0x1890   :  { %v1177_v36 = vadd.f32 %v1175_v35, %v1167_v34 }
0x1892   :  { %2513 = vtanh.f32 %v1177_v36 }
0x189c   :  { %v2514_v38 = vpop.eup %2513 }
0x189d   :  { %1180 = vrot.lane.b32.xlu0 %v2514_v38, %s2576_s19 }
0x190f   :  { %v1181_v39 = vpop.permute.xlu0 %1180 }
0x1910   :  { %v1183_v40 = vmul.f32 %v2512_v31, %v1181_v39 }
0x1912   :  { %1190 = vrot.lane.b32.xlu0 %v1183_v40, %s2577_s20  ;;  %v2583_v40 = vmov 4  }
0x1916   :  { %1185 = vperm.xlu0 %2436, %v2849_v18  }
0x191a   :  { %2438 = vset.pattern.permute.xlu0 %v2582_v16 }
0x1984   :  { %v1191_v41 = vpop.permute.xlu0 %1190 }
0x1985   :  { %2307 = vmatmul.mubr.msk.f32.vlgmr.msra.gmra.mrb[12].mxu1 %vm215_vm2, %v1191_v41 }
0x1986   :  { %2400 = vmatpush3.bf16.msra.mxu1 %v2835_v11  ;;  %2320 = vmatprep.mubr.msk.f32.mxu1 %vm2572_vm1, %v2573_v4 }
0x1987   :  { %2404 = vmatprep.subr.bf16.mxu1 %v2571_v1 }
0x1995   :  { %v1186_v44 = vpop.permute.xlu0 %1185 }
0x1996   :  { %v1188_v45 = vmul.f32 %v2855_v21, %v1186_v44 }
0x1a58   :  { %v1260_v46 = vpop.f32.mrb[12].mxu1 }
0x1a59   :  { %v1264_v47 = vadd.f32 %v1260_v46, %v1188_v45  ;;  %v2308_v48 = vpop.f32.mrb[13].mxu1 }
0x1a5b   :  { %v1265_v49 = vadd.f32 %v2861_v24, %v1264_v47 }
0x1a5d   :  { %2515 = vtanh.f32 %v1265_v49  ;;  %v2144_v51 = vmul.f32 -1.442695, %v1265_v49 }
0x1a5f   :  { %2517 = vpow2.f32 %v2144_v51 }
0x1a67   :  { %v2516_v50 = vpop.eup %2515 }
0x1a68   :  { %1275 = vrot.lane.b32.xlu1 %v2516_v50, %s2574_s18 }
0x1a69   :  { %v2518_v52 = vpop.eup %2517 }
0x1a6a   :  { %v1269_v53 = vadd.f32 1.0, %v2518_v52 }
0x1a6c   :  { %1291 = vperm.xlu1 %2437, %v2849_v18   ;;  %2519 = vrcp.f32 %v1269_v53 }
0x1a76   :  { %v2520_v10 = vpop.eup %2519 }
0x1a77   :  { %v1273_v55 = vmul.f32 %v2520_v10, %v1177_v36 }
0x1ada   :  { %v1276_v43 = vpop.permute.xlu1 %1275 }
0x1adb   :  { %v1278_v54 = vmul.f32 %v2520_v10, %v1276_v43 }
0x1add   :  { %1280 = vrot.lane.b32.xlu0 %v1278_v54, %s2575_s4 }
0x1aeb   :  { %v1292_v62 = vpop.permute.xlu1 %1291 }
0x1aec   :  { %v1294_v63 = vmul.f32 %v2855_v21, %v1292_v62 }
0x1b4f   :  { %v1281_v56 = vpop.permute.xlu0 %1280 }
0x1b50   :  { %v1283_v57 = vadd.f32 %v1281_v56, %v1273_v55 }
0x1b52   :  { %2521 = vtanh.f32 %v1283_v57 }
0x1b5c   :  { %v2522_v58 = vpop.eup %2521 }
0x1b5d   :  { %1286 = vrot.lane.b32.xlu0 %v2522_v58, %s2576_s19 }
0x1bcf   :  { %v1287_v59 = vpop.permute.xlu0 %1286 }
0x1bd0   :  { %v1289_v60 = vmul.f32 %v2520_v10, %v1287_v59 }
0x1bd2   :  { %1296 = vrot.lane.b32.xlu0 %v1289_v60, %s2577_s20  ;;  %v2584_v60 = vmov 5  }
0x1c44   :  { %v1297_v61 = vpop.permute.xlu0 %1296 }
0x1c45   :  { %2314 = vmatmul.mubr.msk.f32.vlgmr.msra.gmra.mrb[14].mxu0 %vm215_vm2, %v1297_v61 }
0x1c46   :  { %2403 = vmatpush3.bf16.msra.mxu0 %v2835_v11  ;;  %2327 = vmatprep.mubr.msk.f32.mxu0 %vm2572_vm1, %v2573_v4 }
0x1c47   :  { %2407 = vmatprep.subr.bf16.mxu0 %v2571_v1 }
0x1d18   :  { %v1366_v2 = vpop.f32.mrb[14].mxu0 }
0x1d19   :  { %v1370_v3 = vadd.f32 %v1366_v2, %v1294_v63  ;;  %v2315_v5 = vpop.f32.mrb[15].mxu0 }
0x1d1b   :  { %v1371_v6 = vadd.f32 %v2861_v24, %v1370_v3 }
0x1d1d   :  { %2523 = vtanh.f32 %v1371_v6  ;;  %v2146_v9 = vmul.f32 -1.442695, %v1371_v6 }
0x1d1f   :  { %2525 = vpow2.f32 %v2146_v9 }
0x1d27   :  { %v2524_v7 = vpop.eup %2523 }
0x1d28   :  { %1381 = vrot.lane.b32.xlu0 %v2524_v7, %s2574_s18 }
0x1d29   :  { %v2526_v12 = vpop.eup %2525 }
0x1d2a   :  { %v1375_v8 = vadd.f32 1.0, %v2526_v12 }
0x1d2c   :  { %2527 = vrcp.f32 %v1375_v8 }
0x1d36   :  { %v2528_v13 = vpop.eup %2527 }
0x1d37   :  { %v1379_v17 = vmul.f32 %v2528_v13, %v1283_v57 }
0x1d9a   :  { %v1382_v14 = vpop.permute.xlu0 %1381 }
0x1d9b   :  { %v1384_v15 = vmul.f32 %v2528_v13, %v1382_v14 }
0x1d9d   :  { %1386 = vrot.lane.b32.xlu1 %v1384_v15, %s2575_s4 }
0x1e0f   :  { %v1387_v19 = vpop.permute.xlu1 %1386 }
0x1e10   :  { %v1389_v20 = vadd.f32 %v1387_v19, %v1379_v17 }
0x1e12   :  { %2529 = vtanh.f32 %v1389_v20 }
0x1e1c   :  { %v2530_v22 = vpop.eup %2529 }
0x1e1d   :  { %1392 = vrot.lane.b32.xlu0 %v2530_v22, %s2576_s19  ;;  %v2585_v22 = vmov 6  }
0x1e21   :  { %1397 = vperm.xlu0 %2438, %v2849_v18  }
0x1e25   :  { %2439 = vset.pattern.permute.xlu0 %v2583_v40 }
0x1e8f   :  { %v1393_v23 = vpop.permute.xlu0 %1392 }
0x1e90   :  { %v1395_v25 = vmul.f32 %v2528_v13, %v1393_v23 }
0x1e92   :  { %1402 = vrot.lane.b32.xlu1 %v1395_v25, %s2577_s20 }
0x1ea0   :  { %v1398_v27 = vpop.permute.xlu0 %1397 }
0x1ea1   :  { %v1400_v28 = vmul.f32 %v2855_v21, %v1398_v27 }
0x1f04   :  { %v1403_v26 = vpop.permute.xlu1 %1402 }
0x1f05   :  { %2321 = vmatmul.mubr.msk.f32.vlgmr.msra.gmra.mrb[14].mxu1 %vm215_vm2, %v1403_v26 }
0x1f06   :  { %2406 = vmatpush3.bf16.msra.mxu1 %v2835_v11  ;;  %2334 = vmatprep.mubr.msk.f32.mxu1 %vm2572_vm1, %v2573_v4 }
0x1f07   :  { %2410 = vmatprep.subr.bf16.mxu1 %v2571_v1 }
0x1fd8   :  { %v1472_v29 = vpop.f32.mrb[14].mxu1 }
0x1fd9   :  { %v1476_v30 = vadd.f32 %v1472_v29, %v1400_v28  ;;  %v2322_v31 = vpop.f32.mrb[15].mxu1 }
0x1fdb   :  { %v1477_v32 = vadd.f32 %v2861_v24, %v1476_v30 }
0x1fdd   :  { %2531 = vtanh.f32 %v1477_v32  ;;  %v2148_v34 = vmul.f32 -1.442695, %v1477_v32 }
0x1fdf   :  { %2533 = vpow2.f32 %v2148_v34 }
0x1fe7   :  { %v2532_v33 = vpop.eup %2531 }
0x1fe8   :  { %1487 = vrot.lane.b32.xlu1 %v2532_v33, %s2574_s18 }
0x1fe9   :  { %v2534_v35 = vpop.eup %2533 }
0x1fea   :  { %v1481_v36 = vadd.f32 1.0, %v2534_v35 }
0x1fec   :  { %2535 = vrcp.f32 %v1481_v36 }
0x1ff6   :  { %v2536_v37 = vpop.eup %2535 }
0x1ff7   :  { %v1485_v41 = vmul.f32 %v2536_v37, %v1389_v20 }
0x205a   :  { %v1488_v38 = vpop.permute.xlu1 %1487 }
0x205b   :  { %v1490_v39 = vmul.f32 %v2536_v37, %v1488_v38 }
0x205d   :  { %1492 = vrot.lane.b32.xlu1 %v1490_v39, %s2575_s4 }
0x20cf   :  { %v1493_v42 = vpop.permute.xlu1 %1492 }
0x20d0   :  { %v1495_v44 = vadd.f32 %v1493_v42, %v1485_v41 }
0x20d2   :  { %2537 = vtanh.f32 %v1495_v44 }
0x20dc   :  { %v2538_v45 = vpop.eup %2537 }
0x20dd   :  { %1498 = vrot.lane.b32.xlu0 %v2538_v45, %s2576_s19  ;;  %v2586_v45 = vmov 7  }
0x20e1   :  { %1503 = vperm.xlu0 %2439, %v2849_v18  }
0x20e5   :  { %2440 = vset.pattern.permute.xlu0 %v2584_v60 }
0x214f   :  { %v1499_v46 = vpop.permute.xlu0 %1498 }
0x2150   :  { %v1501_v47 = vmul.f32 %v2536_v37, %v1499_v46 }
0x2152   :  { %1508 = vrot.lane.b32.xlu1 %v1501_v47, %s2577_s20 }
0x2160   :  { %v1504_v49 = vpop.permute.xlu0 %1503 }
0x2161   :  { %v1506_v50 = vmul.f32 %v2855_v21, %v1504_v49 }
0x21c4   :  { %v1509_v48 = vpop.permute.xlu1 %1508 }
0x21c5   :  { %2328 = vmatmul.mubr.msk.f32.vlgmr.msra.gmra.mrb[16].mxu0 %vm215_vm2, %v1509_v48 }
0x21c6   :  { %2409 = vmatpush3.bf16.msra.mxu0 %v2835_v11  ;;  %2341 = vmatprep.mubr.msk.f32.mxu0 %vm2572_vm1, %v2573_v4 }
0x21c7   :  { %2413 = vmatprep.subr.bf16.mxu0 %v2571_v1 }
0x2298   :  { %v1578_v51 = vpop.f32.mrb[16].mxu0 }
0x2299   :  { %v1582_v52 = vadd.f32 %v1578_v51, %v1506_v50  ;;  %v2329_v53 = vpop.f32.mrb[17].mxu0 }
0x229b   :  { %v1583_v10 = vadd.f32 %v2861_v24, %v1582_v52 }
0x229d   :  { %2539 = vtanh.f32 %v1583_v10  ;;  %v2150_v54 = vmul.f32 -1.442695, %v1583_v10 }
0x229f   :  { %2541 = vpow2.f32 %v2150_v54 }
0x22a7   :  { %v2540_v43 = vpop.eup %2539 }
0x22a8   :  { %1593 = vrot.lane.b32.xlu1 %v2540_v43, %s2574_s18 }
0x22a9   :  { %v2542_v55 = vpop.eup %2541 }
0x22aa   :  { %v1587_v56 = vadd.f32 1.0, %v2542_v55 }
0x22ac   :  { %2543 = vrcp.f32 %v1587_v56 }
0x22b6   :  { %v2544_v57 = vpop.eup %2543 }
0x22b7   :  { %v1591_v61 = vmul.f32 %v2544_v57, %v1495_v44 }
0x231a   :  { %v1594_v58 = vpop.permute.xlu1 %1593 }
0x231b   :  { %v1596_v59 = vmul.f32 %v2544_v57, %v1594_v58 }
0x231d   :  { %1598 = vrot.lane.b32.xlu1 %v1596_v59, %s2575_s4 }
0x238f   :  { %v1599_v62 = vpop.permute.xlu1 %1598 }
0x2390   :  { %v1601_v63 = vadd.f32 %v1599_v62, %v1591_v61 }
0x2392   :  { %2545 = vtanh.f32 %v1601_v63 }
0x239c   :  { %v2546_v2 = vpop.eup %2545 }
0x239d   :  { %1604 = vrot.lane.b32.xlu0 %v2546_v2, %s2576_s19 }
0x23a1   :  { %1609 = vperm.xlu0 %2440, %v2849_v18  }
0x23a5   :  { %2441 = vset.pattern.permute.xlu0 %v2585_v22 }
0x240f   :  { %v1605_v3 = vpop.permute.xlu0 %1604 }
0x2410   :  { %v1607_v5 = vmul.f32 %v2544_v57, %v1605_v3 }
0x2412   :  { %1614 = vrot.lane.b32.xlu1 %v1607_v5, %s2577_s20 }
0x2420   :  { %v1610_v7 = vpop.permute.xlu0 %1609 }
0x2421   :  { %v1612_v9 = vmul.f32 %v2855_v21, %v1610_v7  ;;  %v1926_v7 = vld [vmem:[%s2989_s11] sm:$0xff] }
0x2484   :  { %v1615_v6 = vpop.permute.xlu1 %1614 }
0x2485   :  { %2335 = vmatmul.mubr.msk.f32.vlgmr.msra.gmra.mrb[16].mxu1 %vm215_vm2, %v1615_v6 }
0x2486   :  { %2412 = vmatpush3.bf16.msra.mxu1 %v2835_v11  ;;  %2348 = vmatprep.mubr.msk.f32.mxu1 %vm2572_vm1, %v2573_v4 }
0x2487   :  { %2416 = vmatprep.subr.bf16.mxu1 %v2571_v1 }
0x2558   :  { %v1684_v12 = vpop.f32.mrb[16].mxu1 }
0x2559   :  { %v1688_v8 = vadd.f32 %v1684_v12, %v1612_v9  ;;  %v2336_v13 = vpop.f32.mrb[17].mxu1  ;;  %v1927_v9 = vld [vmem:[%s2989_s11 + $0x8] sm:$0xff] }
0x255a   :  { %v2417_v12 = vpack.c.bf16 %v1927_v9, %v1926_v7 }
0x255b   :  { %v1689_v14 = vadd.f32 %v2861_v24, %v1688_v8 }
0x255d   :  { %2547 = vtanh.f32 %v1689_v14  ;;  %v2152_v16 = vmul.f32 -1.442695, %v1689_v14 }
0x255f   :  { %2549 = vpow2.f32 %v2152_v16  ;;  %v25_v16 = vstv %s2990_s15 }
0x2560   :  { %26 = vst [vmem:[#allocation4] sm:$0x1] %v25_v16 }
0x2567   :  { %v2548_v15 = vpop.eup %2547 }
0x2568   :  { %1699 = vrot.lane.b32.xlu1 %v2548_v15, %s2574_s18 }
0x2569   :  { %v2550_v11 = vpop.eup %2549 }
0x256a   :  { %v1693_v17 = vadd.f32 1.0, %v2550_v11 }
0x256c   :  { %2551 = vrcp.f32 %v1693_v17  ;;  %v2159_v17 = vld [vmem:[%s2991_s13] ss:$0 sm:$0xff] }
0x2576   :  { %v2552_v19 = vpop.eup %2551 }
0x2577   :  { %v1697_v23 = vmul.f32 %v2552_v19, %v1601_v63 }
0x25da   :  { %v1700_v20 = vpop.permute.xlu1 %1699 }
0x25db   :  { %v1702_v1 = vmul.f32 %v2552_v19, %v1700_v20 }
0x25dd   :  { %1704 = vrot.lane.b32.xlu1 %v1702_v1, %s2575_s4  ;;  %v2160_v1 = vld [vmem:[%s2992_s14] ss:$0 sm:$0xff] }
0x264f   :  { %v1705_v25 = vpop.permute.xlu1 %1704 }
0x2650   :  { %v1707_v26 = vadd.f32 %v1705_v25, %v1697_v23 }
0x2652   :  { %2553 = vtanh.f32 %v1707_v26 }
0x265c   :  { %v2554_v27 = vpop.eup %2553 }
0x265d   :  { %1710 = vrot.lane.b32.xlu0 %v2554_v27, %s2576_s19 }
0x2661   :  { %1715 = vperm.xlu0 %2441, %v2849_v18  }
0x2665   :  { %2442 = vset.pattern.permute.xlu0 %v2586_v45 }
0x26cf   :  { %v1711_v28 = vpop.permute.xlu0 %1710 }
0x26d0   :  { %v1713_v29 = vmul.f32 %v2552_v19, %v1711_v28 }
0x26d2   :  { %1720 = vrot.lane.b32.xlu1 %v1713_v29, %s2577_s20 }
0x26e0   :  { %v1716_v31 = vpop.permute.xlu0 %1715 }
0x26e1   :  { %v1718_v32 = vmul.f32 %v2855_v21, %v1716_v31 }
0x2744   :  { %v1721_v30 = vpop.permute.xlu1 %1720 }
0x2745   :  { %2342 = vmatmul.mubr.msk.f32.vlgmr.msra.gmra.mrb[18].mxu0 %vm215_vm2, %v1721_v30 }
0x2746   :  { %2355 = vmatprep.mubr.msk.f32.mxu0 %vm2572_vm1, %v2573_v4 }
0x2818   :  { %v1790_v33 = vpop.f32.mrb[18].mxu0 }
0x2819   :  { %v1794_v34 = vadd.f32 %v1790_v33, %v1718_v32  ;;  %v2343_v35 = vpop.f32.mrb[19].mxu0 }
0x281b   :  { %v1795_v36 = vadd.f32 %v2861_v24, %v1794_v34 }
0x281d   :  { %2555 = vtanh.f32 %v1795_v36  ;;  %v2154_v38 = vmul.f32 -1.442695, %v1795_v36 }
0x281f   :  { %2557 = vpow2.f32 %v2154_v38 }
0x2827   :  { %v2556_v37 = vpop.eup %2555 }
0x2828   :  { %1805 = vrot.lane.b32.xlu1 %v2556_v37, %s2574_s18 }
0x2829   :  { %v2558_v39 = vpop.eup %2557 }
0x282a   :  { %v1799_v40 = vadd.f32 1.0, %v2558_v39 }
0x282c   :  { %2559 = vrcp.f32 %v1799_v40 }
0x2836   :  { %v2560_v41 = vpop.eup %2559 }
0x2837   :  { %v1803_v46 = vmul.f32 %v2560_v41, %v1707_v26  ;;  %v2161_v26 = vld [vmem:[#allocation4] ss:$0 sm:$0xff] }
0x289a   :  { %v1806_v42 = vpop.permute.xlu1 %1805 }
0x289b   :  { %v1808_v44 = vmul.f32 %v2560_v41, %v1806_v42 }
0x289d   :  { %1810 = vrot.lane.b32.xlu1 %v1808_v44, %s2575_s4 }
0x290f   :  { %v1811_v47 = vpop.permute.xlu1 %1810 }
0x2910   :  { %v1813_v48 = vadd.f32 %v1811_v47, %v1803_v46 }
0x2912   :  { %2561 = vtanh.f32 %v1813_v48 }
0x291c   :  { %v2562_v49 = vpop.eup %2561 }
0x291d   :  { %1816 = vrot.lane.b32.xlu0 %v2562_v49, %s2576_s19 }
0x2921   :  { %1821 = vperm.xlu0 %2442, %v2849_v18  }
0x298f   :  { %v1817_v50 = vpop.permute.xlu0 %1816 }
0x2990   :  { %v1819_v51 = vmul.f32 %v2560_v41, %v1817_v50 }
0x2992   :  { %1826 = vrot.lane.b32.xlu1 %v1819_v51, %s2577_s20 }
0x29a0   :  { %v1822_v53 = vpop.permute.xlu0 %1821 }
0x29a1   :  { %v1824_v10 = vmul.f32 %v2855_v21, %v1822_v53  ;;  %v1929_v21 = vld [vmem:[%s2988_s12 + $0x8] sm:$0xff] }
0x2a04   :  { %v1827_v52 = vpop.permute.xlu1 %1826 }
0x2a05   :  { %2349 = vmatmul.mubr.msk.f32.vlgmr.msra.gmra.mrb[18].mxu1 %vm215_vm2, %v1827_v52 }
0x2a06   :  { %2362 = vmatprep.mubr.msk.f32.mxu1 %vm2572_vm1, %v2573_v4  ;;  %v1928_v4 = vld [vmem:[%s2988_s12] sm:$0xff]  ;;  %2418 = vmatpush3.bf16.msra.mxu1 %v2417_v12 }
0x2a07   :  { %v2414_v60 = vpack.c.bf16 %v1929_v21, %v1928_v4 }
0x2a09   :  { %2415 = vmatpush3.bf16.msra.mxu0 %v2414_v60 }
0x2ad8   :  { %v1896_v43 = vpop.f32.mrb[18].mxu1 }
0x2ad9   :  { %v1900_v54 = vadd.f32 %v1896_v43, %v1824_v10  ;;  %v2350_v55 = vpop.f32.mrb[19].mxu1 }
0x2adb   :  { %v1901_v56 = vadd.f32 %v2861_v24, %v1900_v54 }
0x2add   :  { %2563 = vtanh.f32 %v1901_v56  ;;  %v2156_v57 = vmul.f32 -1.442695, %v1901_v56 }
0x2adf   :  { %2565 = vpow2.f32 %v2156_v57 }
0x2ae7   :  { %v2564_v18 = vpop.eup %2563 }
0x2ae8   :  { %1911 = vrot.lane.b32.xlu1 %v2564_v18, %s2574_s18 }
0x2ae9   :  { %v2566_v58 = vpop.eup %2565 }
0x2aea   :  { %v1905_v59 = vadd.f32 1.0, %v2566_v58 }
0x2aec   :  { %2567 = vrcp.f32 %v1905_v59 }
0x2af6   :  { %v2568_v24 = vpop.eup %2567 }
0x2af7   :  { %v1909_v63 = vmul.f32 %v2568_v24, %v1813_v48 }
0x2b5a   :  { %v1912_v61 = vpop.permute.xlu1 %1911 }
0x2b5b   :  { %v1914_v62 = vmul.f32 %v2568_v24, %v1912_v61 }
0x2b5d   :  { %1916 = vrot.lane.b32.xlu1 %v1914_v62, %s2575_s4 }
0x2b61   :  { %1931 = vrot.lane.b32.xlu1 %v2824_v0, %s2577_s20 }
0x2bcf   :  { %v1917_v2 = vpop.permute.xlu1 %1916 }
0x2bd0   :  { %v1919_v3 = vadd.f32 %v1917_v2, %v1909_v63 }
0x2bd2   :  { %2569 = vtanh.f32 %v1919_v3 }
0x2bd3   :  { %v1932_v5 = vpop.permute.xlu1 %1931 }
0x2bd4   :  { %2356 = vmatmul.mubr.msk.f32.vlgmr.msra.gmra.mrb[20].mxu0 %vm215_vm2, %v1932_v5 }
0x2bdc   :  { %v2570_v6 = vpop.eup %2569 }
0x2bdd   :  { %1922 = vrot.lane.b32.xlu0 %v2570_v6, %s2576_s19 }
0x2c4f   :  { %v1923_v0 = vpop.permute.xlu0 %1922 }
0x2c50   :  { %v1925_v8 = vmul.f32 %v2568_v24, %v1923_v0 }
0x2c52   :  { %2006 = vrot.lane.b32.xlu0 %v1925_v8, %s2577_s20 }
0x2ca7   :  { %v2001_v13 = vpop.f32.mrb[20].mxu0 }
0x2ca8   :  { %v2357_v14 = vpop.f32.mrb[21].mxu0 }
0x2cc4   :  { %v2007_v15 = vpop.permute.xlu0 %2006 }
0x2cc5   :  { %2363 = vmatmul.mubr.msk.f32.vlgmr.msra.gmra.mrb[20].mxu1 %vm215_vm2, %v2007_v15 }
0x2d98   :  { %v2076_v11 = vpop.f32.mrb[20].mxu1 }
0x2d99   :  { %v2077_v19 = vadd.f32 %v2076_v11, %v2001_v13  ;;  %v2364_v20 = vpop.f32.mrb[21].mxu1 }
0x2d9b   :  { %v2087_v22 = vadd.f32 %v2159_v17, %v2077_v19 }
0x2d9d   :  { %v2095_v23 = vmul.f32 %v2160_v1, %v2087_v22 }
0x2d9f   :  { %v2096_v25 = vsel %vm215_vm2, %v2095_v23, 0.0 }
0x2da0   :  { %2097 = vadd.xlane.f32.xlu1 %v2096_v25 }
0x2e2d   :  { %v2098_v27 = vpop.xlane.xlu1 %2097 }
0x2e2e   :  { %v2106_v28 = vadd.f32 %v2161_v26, %v2098_v27 }
0x2e30   :  { %2108 = vst.msk [vmem:[%s2993_s16] sm:$0xff] %vm2107_vm3, %v2106_v28 }

</bundles_post_ra>
